<compile_context>
chip_gen: v5e
topology: v5e:2x2
jax: 0.10.0
libtpu: 0.0.40
codegen_flags: <defaults>
</compile_context>

<pallas_src>
import jax
import jax.numpy as jnp
from jax.experimental import pallas as pl
from jax.experimental.pallas import tpu as pltpu

B = 2        # batch
T = 8        # sequence length
I = 14       # input_dim
H = 32       # hidden_dim
NDIR = 2     # bidirectional=True
NLAYERS = 2  # n_layers

BP = 8       # batch padded to a full sublane group -> aligned row blocks
IP = 32      # 2*I padded to 32 lanes

# packed-weight-slab row offsets (every block starts on an 8-row boundary)
R_WIH1, R_B1, R_WHH1, R_WIH2, R_B2 = 0, 32, 40, 104, 168
R_WHH2F, R_WR1, R_BR1, R_WR2, R_BR2 = 176, 208, 272, 280, 312
R_TOTAL = 320


def _sigmoid_fast(x):
    # sigmoid(x) = 0.5*(tanh(x/2) + 1): one EUP tanh instead of exp + divide.
    return 0.5 * jnp.tanh(0.5 * x) + 0.5


def lstm_rul_kernel(x2_ref, w_ref, out_ref, seq1_ref):
    # Static, 8-row-aligned views into the packed weight slab.
    wih1 = w_ref[R_WIH1:R_WIH1 + IP, :]            # (2I_pad, 8H)
    b1 = w_ref[R_B1:R_B1 + 1, :]                   # (1, 8H)
    whh1 = w_ref[R_WHH1:R_WHH1 + 2 * H, :]         # (2H, 8H) block-diagonal
    wih2 = w_ref[R_WIH2:R_WIH2 + 2 * H, :]         # (2H, 8H)
    b2 = w_ref[R_B2:R_B2 + 1, :]                   # (1, 8H)
    whh2f = w_ref[R_WHH2F:R_WHH2F + H, 0:4 * H]    # (H, 4H)
    wr1f = w_ref[R_WR1:R_WR1 + H, 0:H]             # (H, H)
    wr1b = w_ref[R_WR1 + H:R_WR1 + 2 * H, 0:H]     # (H, H)
    br1 = w_ref[R_BR1:R_BR1 + 1, 0:H]              # (1, H)
    wr2 = w_ref[R_WR2:R_WR2 + H, 0:2 * H]          # (H, 2H), prediction in col 0
    br2 = w_ref[R_BR2:R_BR2 + 1, 0:2 * H]          # (1, 2H)

    # ---------------- layer 1 (bidirectional, fused fwd+bwd recurrence) -----
    # One matmul projects BOTH directions: x2 row block s = [x(t=s) | x(t=T-1-s)];
    # wih1 routes the first half into fwd gate columns and the second half into
    # bwd gate columns, so gx1 row block s is already direction-selected.
    gx1 = jnp.dot(x2_ref[...], wih1, preferred_element_type=jnp.float32) + b1

    # Gate column order: [i_f,i_b, f_f,f_b, o_f,o_b, g_f,g_b] -> one contiguous
    # sigmoid over cols 0:6H and one tanh over cols 6H:8H per serial step.
    h_cat = jnp.zeros((BP, 2 * H), jnp.float32)    # [h_fwd | h_bwd]
    c_cat = jnp.zeros((BP, 2 * H), jnp.float32)
    for s in range(T):                             # static unroll, T is tiny
        gates = gx1[s * BP:(s + 1) * BP, :] + jnp.dot(
            h_cat, whh1, preferred_element_type=jnp.float32)     # (BP, 8H)
        sg = _sigmoid_fast(gates[:, 0:6 * H])
        g = jnp.tanh(gates[:, 6 * H:8 * H])
        i = sg[:, 0:2 * H]
        f = sg[:, 2 * H:4 * H]
        o = sg[:, 4 * H:6 * H]
        c_cat = f * c_cat + i * g
        h_cat = o * jnp.tanh(c_cat)
        # one aligned full-row store per step, scan order
        seq1_ref[s * BP:(s + 1) * BP, :] = h_cat

    # TODO(synk): nn.LSTM inter-layer dropout modeled in eval mode (identity).

    # ---------------- layer 2 (bidirectional) -------------------------------
    # seq1 is in scan order: row block s = [h_fwd(t=s) | h_bwd(t=T-1-s)].  The
    # bwd-half time reversal is folded into two accumulating projections; the
    # serial loop only adds two aligned row blocks per step.
    seq1 = seq1_ref[...]
    gx2a = jnp.dot(seq1[:, 0:H], wih2[0:H, :],
                   preferred_element_type=jnp.float32) + b2       # time order
    gx2b = jnp.dot(seq1[:, H:2 * H], wih2[H:2 * H, :],
                   preferred_element_type=jnp.float32)            # reversed order

    # Forward scan: gate cols 0:4H, order [i, f, o, g].
    h2 = jnp.zeros((BP, H), jnp.float32)
    c2 = jnp.zeros((BP, H), jnp.float32)
    for s in range(T):
        gates = (gx2a[s * BP:(s + 1) * BP, 0:4 * H]
                 + gx2b[(T - 1 - s) * BP:(T - s) * BP, 0:4 * H]
                 + jnp.dot(h2, whh2f, preferred_element_type=jnp.float32))
        sg = _sigmoid_fast(gates[:, 0:3 * H])
        g = jnp.tanh(gates[:, 3 * H:4 * H])
        i = sg[:, 0:H]
        f = sg[:, H:2 * H]
        o = sg[:, 2 * H:3 * H]
        c2 = f * c2 + i * g
        h2 = o * jnp.tanh(c2)              # layer-2 fwd hidden at t = T-1

    # Backward direction: only t = T-1 reaches the features; (h, c) start at 0,
    # so it is one element-wise step, no recurrent matmul, no backward scan.
    gb = gx2a[(T - 1) * BP:T * BP, 4 * H:8 * H] + gx2b[0:BP, 4 * H:8 * H]
    sgb = _sigmoid_fast(gb[:, 0:3 * H])
    ib = sgb[:, 0:H]
    ob = sgb[:, 2 * H:3 * H]
    gg = jnp.tanh(gb[:, 3 * H:4 * H])
    hb = ob * jnp.tanh(ib * gg)            # layer-2 bwd hidden at t = T-1

    # -------- regressor: Linear(2H,H) -> ReLU -> Dropout -> Linear(H,1) -----
    # features = [h2 | hb], consumed via two accumulating dots (no lane concat
    # on the serial path).
    hreg = (jnp.dot(h2, wr1f, preferred_element_type=jnp.float32)
            + jnp.dot(hb, wr1b, preferred_element_type=jnp.float32) + br1)
    hreg = jnp.maximum(hreg, 0.0)
    # TODO(synk): regressor nn.Dropout modeled in eval mode (identity).
    pred_blk = jnp.dot(hreg, wr2, preferred_element_type=jnp.float32) + br2  # (BP, 2H)

    # Assemble the (BP, 128) result in registers, single unmasked store:
    # cols 0:2H = features, col 2H = prediction, rest zeros (from wr2 padding).
    out_ref[...] = jnp.concatenate([h2, hb, pred_blk], axis=1)


# ---------------- wrapper-side weight packing (layout plumbing only) --------
def _reorder_cols_ifgo_to_ifog(w):
    """(r, 4H) with gate cols in PyTorch [i,f,g,o] order -> [i,f,o,g]."""
    i, f, g, o = jnp.split(w, 4, axis=1)
    return jnp.concatenate([i, f, o, g], axis=1)


def _reorder_vec_ifgo_to_ifog(b):
    i, f, g, o = jnp.split(b, 4)
    return jnp.concatenate([i, f, o, g])


def _pack_bidir_cols(wf_t, wb_t):
    """fwd/bwd (r, 4H) transposed weights -> (rf+rb, 8H) block matrix with
    columns interleaved per gate: [i_f,i_b,f_f,f_b,o_f,o_b,g_f,g_b]."""
    wf = _reorder_cols_ifgo_to_ifog(wf_t)
    wb = _reorder_cols_ifgo_to_ifog(wb_t)
    rf, rb = wf.shape[0], wb.shape[0]
    zf = jnp.zeros((rf, 4, H), jnp.float32)
    zb = jnp.zeros((rb, 4, H), jnp.float32)
    top = jnp.stack([wf.reshape(rf, 4, H), zf], axis=2).reshape(rf, 8 * H)
    bot = jnp.stack([zb, wb.reshape(rb, 4, H)], axis=2).reshape(rb, 8 * H)
    return jnp.concatenate([top, bot], axis=0)


def _pack_bidir_bias(bf, bb):
    rf = _reorder_vec_ifgo_to_ifog(bf).reshape(4, H)
    rb = _reorder_vec_ifgo_to_ifog(bb).reshape(4, H)
    return jnp.stack([rf, rb], axis=1).reshape(1, 8 * H)


def _pad_block(a, rows, cols=8 * H):
    r, c = a.shape
    return jnp.pad(a, ((0, rows - r), (0, cols - c)))


def pack_weights(p):
    # layer 1: block-structured input projection + block-diagonal recurrence
    wih1 = _pack_bidir_cols(p['w_ih_l0'].T, p['w_ih_l0_rev'].T)            # (2I, 8H)
    b1 = _pack_bidir_bias(p['b_ih_l0'] + p['b_hh_l0'],
                          p['b_ih_l0_rev'] + p['b_hh_l0_rev'])             # (1, 8H)
    whh1 = _pack_bidir_cols(p['w_hh_l0'].T, p['w_hh_l0_rev'].T)            # (2H, 8H)

    # layer 2: cols [fwd 4H | bwd 4H], each direction in [i, f, o, g] order
    wih2 = jnp.concatenate([_reorder_cols_ifgo_to_ifog(p['w_ih_l1'].T),
                            _reorder_cols_ifgo_to_ifog(p['w_ih_l1_rev'].T)],
                           axis=1)                                          # (2H, 8H)
    b2 = jnp.concatenate(
        [_reorder_vec_ifgo_to_ifog(p['b_ih_l1'] + p['b_hh_l1']),
         _reorder_vec_ifgo_to_ifog(p['b_ih_l1_rev'] + p['b_hh_l1_rev'])])[None, :]
    whh2f = _reorder_cols_ifgo_to_ifog(p['w_hh_l1'].T)                      # (H, 4H)

    wr1 = p['w_reg1'].T                                                     # (2H, H)
    br1 = p['b_reg1'][None, :]                                              # (1, H)
    wr2 = jnp.zeros((H, 2 * H), jnp.float32).at[:, 0].set(p['w_reg2'][0])   # (H, 2H)
    br2 = jnp.zeros((1, 2 * H), jnp.float32).at[0, 0].set(p['b_reg2'][0])   # (1, 2H)

    slab = jnp.concatenate([
        _pad_block(wih1, 32), _pad_block(b1, 8), _pad_block(whh1, 64),
        _pad_block(wih2, 64), _pad_block(b2, 8), _pad_block(whh2f, 32),
        _pad_block(wr1, 64), _pad_block(br1, 8), _pad_block(wr2, 32),
        _pad_block(br2, 8),
    ], axis=0)
    assert slab.shape == (R_TOTAL, 8 * H)
    return slab


def lstm_rul_forward(x, p):
    """x: (B, T, I) float32, batch_first like the PyTorch module."""
    # doubled input [x(t) | x(T-1-t)] so gx1 is already direction-selected
    xt = jnp.transpose(x, (1, 0, 2))                       # (T, B, I)
    x_pair = jnp.concatenate([xt, xt[::-1]], axis=2)       # (T, B, 2I)
    x_pair = jnp.pad(x_pair, ((0, 0), (0, BP - B), (0, IP - 2 * I)))
    x2 = x_pair.reshape(T * BP, IP)

    wslab = pack_weights(p)                                # single (320, 256) slab

    vmem = pl.BlockSpec(memory_space=pltpu.MemorySpace.VMEM)
    out = pl.pallas_call(
        lstm_rul_kernel,
        out_shape=jax.ShapeDtypeStruct((BP, 128), jnp.float32),
        in_specs=[vmem, vmem],
        out_specs=vmem,
        scratch_shapes=[pltpu.VMEM((T * BP, 2 * H), jnp.float32)],
        compiler_params=pltpu.CompilerParams(vmem_limit_bytes=4 * 1024 * 1024),
        cost_estimate=pl.CostEstimate(flops=6_000_000, transcendentals=35_000,
                                      bytes_accessed=400_000),
    )(x2, wslab)

    features = out[:B, :2 * H]     # (B, 2H)  == encoder_outputs[:, -1:].squeeze()
    predictions = out[:B, 2 * H]   # (B,)     == regressor(features).squeeze() (B > 1)
    return predictions, features


# ---------------- pure-JAX reference (verification only) --------------------
def reference_forward(x, p):
    def layer(x_seq, l):
        def scan(rev):
            sfx = f"_l{l}" + ("_rev" if rev else "")
            wih, whh = p["w_ih" + sfx], p["w_hh" + sfx]
            bias = p["b_ih" + sfx] + p["b_hh" + sfx]
            h = jnp.zeros((x_seq.shape[0], H), jnp.float32)
            c = jnp.zeros_like(h)
            outs = [None] * T
            order = range(T - 1, -1, -1) if rev else range(T)
            for t in order:
                gates = x_seq[:, t] @ wih.T + bias + h @ whh.T
                i, f, g, o = jnp.split(gates, 4, axis=-1)
                i, f, o = jax.nn.sigmoid(i), jax.nn.sigmoid(f), jax.nn.sigmoid(o)
                g = jnp.tanh(g)
                c = f * c + i * g
                h = o * jnp.tanh(c)
                outs[t] = h
            return jnp.stack(outs, axis=1)              # (B, T, H)
        return jnp.concatenate([scan(False), scan(True)], axis=-1)

    y = layer(x, 0)
    y = layer(y, 1)                  # inter-layer dropout: eval-mode identity
    feats = y[:, -1]                 # (B, 2H)
    hreg = jnp.maximum(feats @ p['w_reg1'].T + p['b_reg1'], 0.0)
    pred = hreg @ p['w_reg2'].T + p['b_reg2']
    return jnp.squeeze(pred, axis=-1), feats


def init_params(key):
    ks = jax.random.split(key, 24)
    it = iter(ks)

    def w(shape, scale=0.1):
        return scale * jax.random.normal(next(it), shape, dtype=jnp.float32)

    p = {}
    for l, in_dim in ((0, I), (1, NDIR * H)):
        for sfx in ("", "_rev"):
            p[f"w_ih_l{l}{sfx}"] = w((4 * H, in_dim))
            p[f"w_hh_l{l}{sfx}"] = w((4 * H, H))
            p[f"b_ih_l{l}{sfx}"] = w((4 * H,))
            p[f"b_hh_l{l}{sfx}"] = w((4 * H,))
    p['w_reg1'] = w((H, NDIR * H))
    p['b_reg1'] = w((H,))
    p['w_reg2'] = w((1, H))
    p['b_reg2'] = w((1,))
    return p


if __name__ == "__main__":
    key = jax.random.PRNGKey(0)
    kx, kp = jax.random.split(key)
    x = jax.random.normal(kx, (B, T, I), dtype=jnp.float32)
    params = init_params(kp)

    pred, feats = lstm_rul_forward(x, params)
    jax.block_until_ready((pred, feats))
    assert pred.shape == (B,) and feats.shape == (B, NDIR * H)

    pred_r, feats_r = reference_forward(x, params)
    for got, ref, name in ((pred, pred_r, "predictions"),
                           (feats, feats_r, "features")):
        if not jnp.allclose(got, ref, atol=1e-3, rtol=1e-3):
            raise AssertionError(
                f"{name} mismatch, max abs diff = {jnp.max(jnp.abs(got - ref))}")

    print("KERNEL_OK")
</pallas_src>

<mosaic_0001>
module attributes {stable_mosaic.version = 11 : i64} {
  func.func @lstm_rul_kernel(%arg0: memref<64x32xf32, #tpu.memory_space<vmem>>, %arg1: memref<320x256xf32, #tpu.memory_space<vmem>>, %arg2: memref<8x128xf32, #tpu.memory_space<vmem>>, %arg3: memref<64x64xf32, #tpu.memory_space<vmem>>) attributes {dimension_semantics = [], scalar_prefetch = 0 : i64, scratch_operands = 1 : i64, tpu.core_type = #tpu.core_type<tc>} {
    %c0 = arith.constant 0 : index
    %c0_0 = arith.constant 0 : index
    %0 = vector.load %arg1[%c0, %c0_0] : memref<320x256xf32, #tpu.memory_space<vmem>>, vector<32x256xf32>
    %c32 = arith.constant 32 : index
    %c0_1 = arith.constant 0 : index
    %1 = vector.load %arg1[%c32, %c0_1] : memref<320x256xf32, #tpu.memory_space<vmem>>, vector<1x256xf32>
    %c40 = arith.constant 40 : index
    %c0_2 = arith.constant 0 : index
    %2 = vector.load %arg1[%c40, %c0_2] : memref<320x256xf32, #tpu.memory_space<vmem>>, vector<64x256xf32>
    %c104 = arith.constant 104 : index
    %c0_3 = arith.constant 0 : index
    %3 = vector.load %arg1[%c104, %c0_3] : memref<320x256xf32, #tpu.memory_space<vmem>>, vector<64x256xf32>
    %c168 = arith.constant 168 : index
    %c0_4 = arith.constant 0 : index
    %4 = vector.load %arg1[%c168, %c0_4] : memref<320x256xf32, #tpu.memory_space<vmem>>, vector<1x256xf32>
    %c176 = arith.constant 176 : index
    %c0_5 = arith.constant 0 : index
    %5 = vector.load %arg1[%c176, %c0_5] : memref<320x256xf32, #tpu.memory_space<vmem>>, vector<32x128xf32>
    %c208 = arith.constant 208 : index
    %c0_6 = arith.constant 0 : index
    %6 = vector.load %arg1[%c208, %c0_6] : memref<320x256xf32, #tpu.memory_space<vmem>>, vector<32x32xf32>
    %c240 = arith.constant 240 : index
    %c0_7 = arith.constant 0 : index
    %7 = vector.load %arg1[%c240, %c0_7] : memref<320x256xf32, #tpu.memory_space<vmem>>, vector<32x32xf32>
    %c272 = arith.constant 272 : index
    %c0_8 = arith.constant 0 : index
    %8 = vector.load %arg1[%c272, %c0_8] : memref<320x256xf32, #tpu.memory_space<vmem>>, vector<1x32xf32>
    %c280 = arith.constant 280 : index
    %c0_9 = arith.constant 0 : index
    %9 = vector.load %arg1[%c280, %c0_9] : memref<320x256xf32, #tpu.memory_space<vmem>>, vector<32x64xf32>
    %c312 = arith.constant 312 : index
    %c0_10 = arith.constant 0 : index
    %10 = vector.load %arg1[%c312, %c0_10] : memref<320x256xf32, #tpu.memory_space<vmem>>, vector<1x64xf32>
    %c0_11 = arith.constant 0 : index
    %c0_12 = arith.constant 0 : index
    %11 = vector.load %arg0[%c0_11, %c0_12] : memref<64x32xf32, #tpu.memory_space<vmem>>, vector<64x32xf32>
    %cst = arith.constant dense<0.000000e+00> : vector<64x256xf32>
    %12 = tpu.matmul %11, %0, %cst {dimension_numbers = #tpu.dot_dimension_numbers<[1], [0], [0], [1], [0, 0, 1, 1], [], []>} : vector<64x32xf32>, vector<32x256xf32>, vector<64x256xf32> -> vector<64x256xf32>
    %13 = vector.broadcast %1 : vector<1x256xf32> to vector<64x256xf32>
    %14 = arith.addf %12, %13 : vector<64x256xf32>
    %cst_13 = arith.constant 0.000000e+00 : f32
    %15 = vector.broadcast %cst_13 : f32 to vector<8x64xf32>
    %cst_14 = arith.constant 0.000000e+00 : f32
    %16 = vector.broadcast %cst_14 : f32 to vector<8x64xf32>
    %17 = vector.extract_strided_slice %14 {offsets = [0, 0], sizes = [8, 256], strides = [1, 1]} : vector<64x256xf32> to vector<8x256xf32>
    %cst_15 = arith.constant dense<0.000000e+00> : vector<8x256xf32>
    %18 = tpu.matmul %15, %2, %cst_15 {dimension_numbers = #tpu.dot_dimension_numbers<[1], [0], [0], [1], [0, 0, 1, 1], [], []>} : vector<8x64xf32>, vector<64x256xf32>, vector<8x256xf32> -> vector<8x256xf32>
    %19 = arith.addf %17, %18 : vector<8x256xf32>
    %20 = vector.extract_strided_slice %19 {offsets = [0, 0], sizes = [8, 192], strides = [1, 1]} : vector<8x256xf32> to vector<8x192xf32>
    %cst_16 = arith.constant 5.000000e-01 : f32
    %21 = vector.broadcast %cst_16 : f32 to vector<8x192xf32>
    %22 = arith.mulf %21, %20 : vector<8x192xf32>
    %23 = math.tanh %22 : vector<8x192xf32>
    %cst_17 = arith.constant 5.000000e-01 : f32
    %24 = vector.broadcast %cst_17 : f32 to vector<8x192xf32>
    %25 = arith.mulf %24, %23 : vector<8x192xf32>
    %cst_18 = arith.constant 5.000000e-01 : f32
    %26 = vector.broadcast %cst_18 : f32 to vector<8x192xf32>
    %27 = arith.addf %25, %26 : vector<8x192xf32>
    %28 = vector.extract_strided_slice %19 {offsets = [0, 192], sizes = [8, 64], strides = [1, 1]} : vector<8x256xf32> to vector<8x64xf32>
    %29 = math.tanh %28 : vector<8x64xf32>
    %30 = vector.extract_strided_slice %27 {offsets = [0, 0], sizes = [8, 64], strides = [1, 1]} : vector<8x192xf32> to vector<8x64xf32>
    %31 = vector.extract_strided_slice %27 {offsets = [0, 64], sizes = [8, 64], strides = [1, 1]} : vector<8x192xf32> to vector<8x64xf32>
    %32 = vector.extract_strided_slice %27 {offsets = [0, 128], sizes = [8, 64], strides = [1, 1]} : vector<8x192xf32> to vector<8x64xf32>
    %33 = arith.mulf %31, %16 : vector<8x64xf32>
    %34 = arith.mulf %30, %29 : vector<8x64xf32>
    %35 = arith.addf %33, %34 : vector<8x64xf32>
    %36 = math.tanh %35 : vector<8x64xf32>
    %37 = arith.mulf %32, %36 : vector<8x64xf32>
    %c0_19 = arith.constant 0 : index
    %c0_20 = arith.constant 0 : index
    %38 = vector.load %arg3[%c0_19, %c0_20] : memref<64x64xf32, #tpu.memory_space<vmem>>, vector<8x64xf32>
    tpu.vector_store %arg3[%c0_19, %c0_20], %37 {strides = array<i32>} : memref<64x64xf32, #tpu.memory_space<vmem>>, vector<8x64xf32>,
    %39 = vector.extract_strided_slice %14 {offsets = [8, 0], sizes = [8, 256], strides = [1, 1]} : vector<64x256xf32> to vector<8x256xf32>
    %cst_21 = arith.constant dense<0.000000e+00> : vector<8x256xf32>
    %40 = tpu.matmul %37, %2, %cst_21 {dimension_numbers = #tpu.dot_dimension_numbers<[1], [0], [0], [1], [0, 0, 1, 1], [], []>} : vector<8x64xf32>, vector<64x256xf32>, vector<8x256xf32> -> vector<8x256xf32>
    %41 = arith.addf %39, %40 : vector<8x256xf32>
    %42 = vector.extract_strided_slice %41 {offsets = [0, 0], sizes = [8, 192], strides = [1, 1]} : vector<8x256xf32> to vector<8x192xf32>
    %cst_22 = arith.constant 5.000000e-01 : f32
    %43 = vector.broadcast %cst_22 : f32 to vector<8x192xf32>
    %44 = arith.mulf %43, %42 : vector<8x192xf32>
    %45 = math.tanh %44 : vector<8x192xf32>
    %cst_23 = arith.constant 5.000000e-01 : f32
    %46 = vector.broadcast %cst_23 : f32 to vector<8x192xf32>
    %47 = arith.mulf %46, %45 : vector<8x192xf32>
    %cst_24 = arith.constant 5.000000e-01 : f32
    %48 = vector.broadcast %cst_24 : f32 to vector<8x192xf32>
    %49 = arith.addf %47, %48 : vector<8x192xf32>
    %50 = vector.extract_strided_slice %41 {offsets = [0, 192], sizes = [8, 64], strides = [1, 1]} : vector<8x256xf32> to vector<8x64xf32>
    %51 = math.tanh %50 : vector<8x64xf32>
    %52 = vector.extract_strided_slice %49 {offsets = [0, 0], sizes = [8, 64], strides = [1, 1]} : vector<8x192xf32> to vector<8x64xf32>
    %53 = vector.extract_strided_slice %49 {offsets = [0, 64], sizes = [8, 64], strides = [1, 1]} : vector<8x192xf32> to vector<8x64xf32>
    %54 = vector.extract_strided_slice %49 {offsets = [0, 128], sizes = [8, 64], strides = [1, 1]} : vector<8x192xf32> to vector<8x64xf32>
    %55 = arith.mulf %53, %35 : vector<8x64xf32>
    %56 = arith.mulf %52, %51 : vector<8x64xf32>
    %57 = arith.addf %55, %56 : vector<8x64xf32>
    %58 = math.tanh %57 : vector<8x64xf32>
    %59 = arith.mulf %54, %58 : vector<8x64xf32>
    %c8 = arith.constant 8 : index
    %c0_25 = arith.constant 0 : index
    %60 = vector.load %arg3[%c8, %c0_25] : memref<64x64xf32, #tpu.memory_space<vmem>>, vector<8x64xf32>
    tpu.vector_store %arg3[%c8, %c0_25], %59 {strides = array<i32>} : memref<64x64xf32, #tpu.memory_space<vmem>>, vector<8x64xf32>,
    %61 = vector.extract_strided_slice %14 {offsets = [16, 0], sizes = [8, 256], strides = [1, 1]} : vector<64x256xf32> to vector<8x256xf32>
    %cst_26 = arith.constant dense<0.000000e+00> : vector<8x256xf32>
    %62 = tpu.matmul %59, %2, %cst_26 {dimension_numbers = #tpu.dot_dimension_numbers<[1], [0], [0], [1], [0, 0, 1, 1], [], []>} : vector<8x64xf32>, vector<64x256xf32>, vector<8x256xf32> -> vector<8x256xf32>
    %63 = arith.addf %61, %62 : vector<8x256xf32>
    %64 = vector.extract_strided_slice %63 {offsets = [0, 0], sizes = [8, 192], strides = [1, 1]} : vector<8x256xf32> to vector<8x192xf32>
    %cst_27 = arith.constant 5.000000e-01 : f32
    %65 = vector.broadcast %cst_27 : f32 to vector<8x192xf32>
    %66 = arith.mulf %65, %64 : vector<8x192xf32>
    %67 = math.tanh %66 : vector<8x192xf32>
    %cst_28 = arith.constant 5.000000e-01 : f32
    %68 = vector.broadcast %cst_28 : f32 to vector<8x192xf32>
    %69 = arith.mulf %68, %67 : vector<8x192xf32>
    %cst_29 = arith.constant 5.000000e-01 : f32
    %70 = vector.broadcast %cst_29 : f32 to vector<8x192xf32>
    %71 = arith.addf %69, %70 : vector<8x192xf32>
    %72 = vector.extract_strided_slice %63 {offsets = [0, 192], sizes = [8, 64], strides = [1, 1]} : vector<8x256xf32> to vector<8x64xf32>
    %73 = math.tanh %72 : vector<8x64xf32>
    %74 = vector.extract_strided_slice %71 {offsets = [0, 0], sizes = [8, 64], strides = [1, 1]} : vector<8x192xf32> to vector<8x64xf32>
    %75 = vector.extract_strided_slice %71 {offsets = [0, 64], sizes = [8, 64], strides = [1, 1]} : vector<8x192xf32> to vector<8x64xf32>
    %76 = vector.extract_strided_slice %71 {offsets = [0, 128], sizes = [8, 64], strides = [1, 1]} : vector<8x192xf32> to vector<8x64xf32>
    %77 = arith.mulf %75, %57 : vector<8x64xf32>
    %78 = arith.mulf %74, %73 : vector<8x64xf32>
    %79 = arith.addf %77, %78 : vector<8x64xf32>
    %80 = math.tanh %79 : vector<8x64xf32>
    %81 = arith.mulf %76, %80 : vector<8x64xf32>
    %c16 = arith.constant 16 : index
    %c0_30 = arith.constant 0 : index
    %82 = vector.load %arg3[%c16, %c0_30] : memref<64x64xf32, #tpu.memory_space<vmem>>, vector<8x64xf32>
    tpu.vector_store %arg3[%c16, %c0_30], %81 {strides = array<i32>} : memref<64x64xf32, #tpu.memory_space<vmem>>, vector<8x64xf32>,
    %83 = vector.extract_strided_slice %14 {offsets = [24, 0], sizes = [8, 256], strides = [1, 1]} : vector<64x256xf32> to vector<8x256xf32>
    %cst_31 = arith.constant dense<0.000000e+00> : vector<8x256xf32>
    %84 = tpu.matmul %81, %2, %cst_31 {dimension_numbers = #tpu.dot_dimension_numbers<[1], [0], [0], [1], [0, 0, 1, 1], [], []>} : vector<8x64xf32>, vector<64x256xf32>, vector<8x256xf32> -> vector<8x256xf32>
    %85 = arith.addf %83, %84 : vector<8x256xf32>
    %86 = vector.extract_strided_slice %85 {offsets = [0, 0], sizes = [8, 192], strides = [1, 1]} : vector<8x256xf32> to vector<8x192xf32>
    %cst_32 = arith.constant 5.000000e-01 : f32
    %87 = vector.broadcast %cst_32 : f32 to vector<8x192xf32>
    %88 = arith.mulf %87, %86 : vector<8x192xf32>
    %89 = math.tanh %88 : vector<8x192xf32>
    %cst_33 = arith.constant 5.000000e-01 : f32
    %90 = vector.broadcast %cst_33 : f32 to vector<8x192xf32>
    %91 = arith.mulf %90, %89 : vector<8x192xf32>
    %cst_34 = arith.constant 5.000000e-01 : f32
    %92 = vector.broadcast %cst_34 : f32 to vector<8x192xf32>
    %93 = arith.addf %91, %92 : vector<8x192xf32>
    %94 = vector.extract_strided_slice %85 {offsets = [0, 192], sizes = [8, 64], strides = [1, 1]} : vector<8x256xf32> to vector<8x64xf32>
    %95 = math.tanh %94 : vector<8x64xf32>
    %96 = vector.extract_strided_slice %93 {offsets = [0, 0], sizes = [8, 64], strides = [1, 1]} : vector<8x192xf32> to vector<8x64xf32>
    %97 = vector.extract_strided_slice %93 {offsets = [0, 64], sizes = [8, 64], strides = [1, 1]} : vector<8x192xf32> to vector<8x64xf32>
    %98 = vector.extract_strided_slice %93 {offsets = [0, 128], sizes = [8, 64], strides = [1, 1]} : vector<8x192xf32> to vector<8x64xf32>
    %99 = arith.mulf %97, %79 : vector<8x64xf32>
    %100 = arith.mulf %96, %95 : vector<8x64xf32>
    %101 = arith.addf %99, %100 : vector<8x64xf32>
    %102 = math.tanh %101 : vector<8x64xf32>
    %103 = arith.mulf %98, %102 : vector<8x64xf32>
    %c24 = arith.constant 24 : index
    %c0_35 = arith.constant 0 : index
    %104 = vector.load %arg3[%c24, %c0_35] : memref<64x64xf32, #tpu.memory_space<vmem>>, vector<8x64xf32>
    tpu.vector_store %arg3[%c24, %c0_35], %103 {strides = array<i32>} : memref<64x64xf32, #tpu.memory_space<vmem>>, vector<8x64xf32>,
    %105 = vector.extract_strided_slice %14 {offsets = [32, 0], sizes = [8, 256], strides = [1, 1]} : vector<64x256xf32> to vector<8x256xf32>
    %cst_36 = arith.constant dense<0.000000e+00> : vector<8x256xf32>
    %106 = tpu.matmul %103, %2, %cst_36 {dimension_numbers = #tpu.dot_dimension_numbers<[1], [0], [0], [1], [0, 0, 1, 1], [], []>} : vector<8x64xf32>, vector<64x256xf32>, vector<8x256xf32> -> vector<8x256xf32>
    %107 = arith.addf %105, %106 : vector<8x256xf32>
    %108 = vector.extract_strided_slice %107 {offsets = [0, 0], sizes = [8, 192], strides = [1, 1]} : vector<8x256xf32> to vector<8x192xf32>
    %cst_37 = arith.constant 5.000000e-01 : f32
    %109 = vector.broadcast %cst_37 : f32 to vector<8x192xf32>
    %110 = arith.mulf %109, %108 : vector<8x192xf32>
    %111 = math.tanh %110 : vector<8x192xf32>
    %cst_38 = arith.constant 5.000000e-01 : f32
    %112 = vector.broadcast %cst_38 : f32 to vector<8x192xf32>
    %113 = arith.mulf %112, %111 : vector<8x192xf32>
    %cst_39 = arith.constant 5.000000e-01 : f32
    %114 = vector.broadcast %cst_39 : f32 to vector<8x192xf32>
    %115 = arith.addf %113, %114 : vector<8x192xf32>
    %116 = vector.extract_strided_slice %107 {offsets = [0, 192], sizes = [8, 64], strides = [1, 1]} : vector<8x256xf32> to vector<8x64xf32>
    %117 = math.tanh %116 : vector<8x64xf32>
    %118 = vector.extract_strided_slice %115 {offsets = [0, 0], sizes = [8, 64], strides = [1, 1]} : vector<8x192xf32> to vector<8x64xf32>
    %119 = vector.extract_strided_slice %115 {offsets = [0, 64], sizes = [8, 64], strides = [1, 1]} : vector<8x192xf32> to vector<8x64xf32>
    %120 = vector.extract_strided_slice %115 {offsets = [0, 128], sizes = [8, 64], strides = [1, 1]} : vector<8x192xf32> to vector<8x64xf32>
    %121 = arith.mulf %119, %101 : vector<8x64xf32>
    %122 = arith.mulf %118, %117 : vector<8x64xf32>
    %123 = arith.addf %121, %122 : vector<8x64xf32>
    %124 = math.tanh %123 : vector<8x64xf32>
    %125 = arith.mulf %120, %124 : vector<8x64xf32>
    %c32_40 = arith.constant 32 : index
    %c0_41 = arith.constant 0 : index
    %126 = vector.load %arg3[%c32_40, %c0_41] : memref<64x64xf32, #tpu.memory_space<vmem>>, vector<8x64xf32>
    tpu.vector_store %arg3[%c32_40, %c0_41], %125 {strides = array<i32>} : memref<64x64xf32, #tpu.memory_space<vmem>>, vector<8x64xf32>,
    %127 = vector.extract_strided_slice %14 {offsets = [40, 0], sizes = [8, 256], strides = [1, 1]} : vector<64x256xf32> to vector<8x256xf32>
    %cst_42 = arith.constant dense<0.000000e+00> : vector<8x256xf32>
    %128 = tpu.matmul %125, %2, %cst_42 {dimension_numbers = #tpu.dot_dimension_numbers<[1], [0], [0], [1], [0, 0, 1, 1], [], []>} : vector<8x64xf32>, vector<64x256xf32>, vector<8x256xf32> -> vector<8x256xf32>
    %129 = arith.addf %127, %128 : vector<8x256xf32>
    %130 = vector.extract_strided_slice %129 {offsets = [0, 0], sizes = [8, 192], strides = [1, 1]} : vector<8x256xf32> to vector<8x192xf32>
    %cst_43 = arith.constant 5.000000e-01 : f32
    %131 = vector.broadcast %cst_43 : f32 to vector<8x192xf32>
    %132 = arith.mulf %131, %130 : vector<8x192xf32>
    %133 = math.tanh %132 : vector<8x192xf32>
    %cst_44 = arith.constant 5.000000e-01 : f32
    %134 = vector.broadcast %cst_44 : f32 to vector<8x192xf32>
    %135 = arith.mulf %134, %133 : vector<8x192xf32>
    %cst_45 = arith.constant 5.000000e-01 : f32
    %136 = vector.broadcast %cst_45 : f32 to vector<8x192xf32>
    %137 = arith.addf %135, %136 : vector<8x192xf32>
    %138 = vector.extract_strided_slice %129 {offsets = [0, 192], sizes = [8, 64], strides = [1, 1]} : vector<8x256xf32> to vector<8x64xf32>
    %139 = math.tanh %138 : vector<8x64xf32>
    %140 = vector.extract_strided_slice %137 {offsets = [0, 0], sizes = [8, 64], strides = [1, 1]} : vector<8x192xf32> to vector<8x64xf32>
    %141 = vector.extract_strided_slice %137 {offsets = [0, 64], sizes = [8, 64], strides = [1, 1]} : vector<8x192xf32> to vector<8x64xf32>
    %142 = vector.extract_strided_slice %137 {offsets = [0, 128], sizes = [8, 64], strides = [1, 1]} : vector<8x192xf32> to vector<8x64xf32>
    %143 = arith.mulf %141, %123 : vector<8x64xf32>
    %144 = arith.mulf %140, %139 : vector<8x64xf32>
    %145 = arith.addf %143, %144 : vector<8x64xf32>
    %146 = math.tanh %145 : vector<8x64xf32>
    %147 = arith.mulf %142, %146 : vector<8x64xf32>
    %c40_46 = arith.constant 40 : index
    %c0_47 = arith.constant 0 : index
    %148 = vector.load %arg3[%c40_46, %c0_47] : memref<64x64xf32, #tpu.memory_space<vmem>>, vector<8x64xf32>
    tpu.vector_store %arg3[%c40_46, %c0_47], %147 {strides = array<i32>} : memref<64x64xf32, #tpu.memory_space<vmem>>, vector<8x64xf32>,
    %149 = vector.extract_strided_slice %14 {offsets = [48, 0], sizes = [8, 256], strides = [1, 1]} : vector<64x256xf32> to vector<8x256xf32>
    %cst_48 = arith.constant dense<0.000000e+00> : vector<8x256xf32>
    %150 = tpu.matmul %147, %2, %cst_48 {dimension_numbers = #tpu.dot_dimension_numbers<[1], [0], [0], [1], [0, 0, 1, 1], [], []>} : vector<8x64xf32>, vector<64x256xf32>, vector<8x256xf32> -> vector<8x256xf32>
    %151 = arith.addf %149, %150 : vector<8x256xf32>
    %152 = vector.extract_strided_slice %151 {offsets = [0, 0], sizes = [8, 192], strides = [1, 1]} : vector<8x256xf32> to vector<8x192xf32>
    %cst_49 = arith.constant 5.000000e-01 : f32
    %153 = vector.broadcast %cst_49 : f32 to vector<8x192xf32>
    %154 = arith.mulf %153, %152 : vector<8x192xf32>
    %155 = math.tanh %154 : vector<8x192xf32>
    %cst_50 = arith.constant 5.000000e-01 : f32
    %156 = vector.broadcast %cst_50 : f32 to vector<8x192xf32>
    %157 = arith.mulf %156, %155 : vector<8x192xf32>
    %cst_51 = arith.constant 5.000000e-01 : f32
    %158 = vector.broadcast %cst_51 : f32 to vector<8x192xf32>
    %159 = arith.addf %157, %158 : vector<8x192xf32>
    %160 = vector.extract_strided_slice %151 {offsets = [0, 192], sizes = [8, 64], strides = [1, 1]} : vector<8x256xf32> to vector<8x64xf32>
    %161 = math.tanh %160 : vector<8x64xf32>
    %162 = vector.extract_strided_slice %159 {offsets = [0, 0], sizes = [8, 64], strides = [1, 1]} : vector<8x192xf32> to vector<8x64xf32>
    %163 = vector.extract_strided_slice %159 {offsets = [0, 64], sizes = [8, 64], strides = [1, 1]} : vector<8x192xf32> to vector<8x64xf32>
    %164 = vector.extract_strided_slice %159 {offsets = [0, 128], sizes = [8, 64], strides = [1, 1]} : vector<8x192xf32> to vector<8x64xf32>
    %165 = arith.mulf %163, %145 : vector<8x64xf32>
    %166 = arith.mulf %162, %161 : vector<8x64xf32>
    %167 = arith.addf %165, %166 : vector<8x64xf32>
    %168 = math.tanh %167 : vector<8x64xf32>
    %169 = arith.mulf %164, %168 : vector<8x64xf32>
    %c48 = arith.constant 48 : index
    %c0_52 = arith.constant 0 : index
    %170 = vector.load %arg3[%c48, %c0_52] : memref<64x64xf32, #tpu.memory_space<vmem>>, vector<8x64xf32>
    tpu.vector_store %arg3[%c48, %c0_52], %169 {strides = array<i32>} : memref<64x64xf32, #tpu.memory_space<vmem>>, vector<8x64xf32>,
    %171 = vector.extract_strided_slice %14 {offsets = [56, 0], sizes = [8, 256], strides = [1, 1]} : vector<64x256xf32> to vector<8x256xf32>
    %cst_53 = arith.constant dense<0.000000e+00> : vector<8x256xf32>
    %172 = tpu.matmul %169, %2, %cst_53 {dimension_numbers = #tpu.dot_dimension_numbers<[1], [0], [0], [1], [0, 0, 1, 1], [], []>} : vector<8x64xf32>, vector<64x256xf32>, vector<8x256xf32> -> vector<8x256xf32>
    %173 = arith.addf %171, %172 : vector<8x256xf32>
    %174 = vector.extract_strided_slice %173 {offsets = [0, 0], sizes = [8, 192], strides = [1, 1]} : vector<8x256xf32> to vector<8x192xf32>
    %cst_54 = arith.constant 5.000000e-01 : f32
    %175 = vector.broadcast %cst_54 : f32 to vector<8x192xf32>
    %176 = arith.mulf %175, %174 : vector<8x192xf32>
    %177 = math.tanh %176 : vector<8x192xf32>
    %cst_55 = arith.constant 5.000000e-01 : f32
    %178 = vector.broadcast %cst_55 : f32 to vector<8x192xf32>
    %179 = arith.mulf %178, %177 : vector<8x192xf32>
    %cst_56 = arith.constant 5.000000e-01 : f32
    %180 = vector.broadcast %cst_56 : f32 to vector<8x192xf32>
    %181 = arith.addf %179, %180 : vector<8x192xf32>
    %182 = vector.extract_strided_slice %173 {offsets = [0, 192], sizes = [8, 64], strides = [1, 1]} : vector<8x256xf32> to vector<8x64xf32>
    %183 = math.tanh %182 : vector<8x64xf32>
    %184 = vector.extract_strided_slice %181 {offsets = [0, 0], sizes = [8, 64], strides = [1, 1]} : vector<8x192xf32> to vector<8x64xf32>
    %185 = vector.extract_strided_slice %181 {offsets = [0, 64], sizes = [8, 64], strides = [1, 1]} : vector<8x192xf32> to vector<8x64xf32>
    %186 = vector.extract_strided_slice %181 {offsets = [0, 128], sizes = [8, 64], strides = [1, 1]} : vector<8x192xf32> to vector<8x64xf32>
    %187 = arith.mulf %185, %167 : vector<8x64xf32>
    %188 = arith.mulf %184, %183 : vector<8x64xf32>
    %189 = arith.addf %187, %188 : vector<8x64xf32>
    %190 = math.tanh %189 : vector<8x64xf32>
    %191 = arith.mulf %186, %190 : vector<8x64xf32>
    %c56 = arith.constant 56 : index
    %c0_57 = arith.constant 0 : index
    %192 = vector.load %arg3[%c56, %c0_57] : memref<64x64xf32, #tpu.memory_space<vmem>>, vector<8x64xf32>
    tpu.vector_store %arg3[%c56, %c0_57], %191 {strides = array<i32>} : memref<64x64xf32, #tpu.memory_space<vmem>>, vector<8x64xf32>,
    %c0_58 = arith.constant 0 : index
    %c0_59 = arith.constant 0 : index
    %193 = vector.load %arg3[%c0_58, %c0_59] : memref<64x64xf32, #tpu.memory_space<vmem>>, vector<64x64xf32>
    %194 = vector.extract_strided_slice %193 {offsets = [0, 0], sizes = [64, 32], strides = [1, 1]} : vector<64x64xf32> to vector<64x32xf32>
    %195 = vector.extract_strided_slice %3 {offsets = [0, 0], sizes = [32, 256], strides = [1, 1]} : vector<64x256xf32> to vector<32x256xf32>
    %cst_60 = arith.constant dense<0.000000e+00> : vector<64x256xf32>
    %196 = tpu.matmul %194, %195, %cst_60 {dimension_numbers = #tpu.dot_dimension_numbers<[1], [0], [0], [1], [0, 0, 1, 1], [], []>} : vector<64x32xf32>, vector<32x256xf32>, vector<64x256xf32> -> vector<64x256xf32>
    %197 = vector.broadcast %4 : vector<1x256xf32> to vector<64x256xf32>
    %198 = arith.addf %196, %197 : vector<64x256xf32>
    %199 = vector.extract_strided_slice %193 {offsets = [0, 32], sizes = [64, 32], strides = [1, 1]} : vector<64x64xf32> to vector<64x32xf32>
    %200 = vector.extract_strided_slice %3 {offsets = [32, 0], sizes = [32, 256], strides = [1, 1]} : vector<64x256xf32> to vector<32x256xf32>
    %cst_61 = arith.constant dense<0.000000e+00> : vector<64x256xf32>
    %201 = tpu.matmul %199, %200, %cst_61 {dimension_numbers = #tpu.dot_dimension_numbers<[1], [0], [0], [1], [0, 0, 1, 1], [], []>} : vector<64x32xf32>, vector<32x256xf32>, vector<64x256xf32> -> vector<64x256xf32>
    %cst_62 = arith.constant 0.000000e+00 : f32
    %202 = vector.broadcast %cst_62 : f32 to vector<8x32xf32>
    %cst_63 = arith.constant 0.000000e+00 : f32
    %203 = vector.broadcast %cst_63 : f32 to vector<8x32xf32>
    %204 = vector.extract_strided_slice %198 {offsets = [0, 0], sizes = [8, 128], strides = [1, 1]} : vector<64x256xf32> to vector<8x128xf32>
    %205 = vector.extract_strided_slice %201 {offsets = [56, 0], sizes = [8, 128], strides = [1, 1]} : vector<64x256xf32> to vector<8x128xf32>
    %206 = arith.addf %204, %205 : vector<8x128xf32>
    %cst_64 = arith.constant dense<0.000000e+00> : vector<8x128xf32>
    %207 = tpu.matmul %202, %5, %cst_64 {dimension_numbers = #tpu.dot_dimension_numbers<[1], [0], [0], [1], [0, 0, 1, 1], [], []>} : vector<8x32xf32>, vector<32x128xf32>, vector<8x128xf32> -> vector<8x128xf32>
    %208 = arith.addf %206, %207 : vector<8x128xf32>
    %209 = vector.extract_strided_slice %208 {offsets = [0, 0], sizes = [8, 96], strides = [1, 1]} : vector<8x128xf32> to vector<8x96xf32>
    %cst_65 = arith.constant 5.000000e-01 : f32
    %210 = vector.broadcast %cst_65 : f32 to vector<8x96xf32>
    %211 = arith.mulf %210, %209 : vector<8x96xf32>
    %212 = math.tanh %211 : vector<8x96xf32>
    %cst_66 = arith.constant 5.000000e-01 : f32
    %213 = vector.broadcast %cst_66 : f32 to vector<8x96xf32>
    %214 = arith.mulf %213, %212 : vector<8x96xf32>
    %cst_67 = arith.constant 5.000000e-01 : f32
    %215 = vector.broadcast %cst_67 : f32 to vector<8x96xf32>
    %216 = arith.addf %214, %215 : vector<8x96xf32>
    %217 = vector.extract_strided_slice %208 {offsets = [0, 96], sizes = [8, 32], strides = [1, 1]} : vector<8x128xf32> to vector<8x32xf32>
    %218 = math.tanh %217 : vector<8x32xf32>
    %219 = vector.extract_strided_slice %216 {offsets = [0, 0], sizes = [8, 32], strides = [1, 1]} : vector<8x96xf32> to vector<8x32xf32>
    %220 = vector.extract_strided_slice %216 {offsets = [0, 32], sizes = [8, 32], strides = [1, 1]} : vector<8x96xf32> to vector<8x32xf32>
    %221 = vector.extract_strided_slice %216 {offsets = [0, 64], sizes = [8, 32], strides = [1, 1]} : vector<8x96xf32> to vector<8x32xf32>
    %222 = arith.mulf %220, %203 : vector<8x32xf32>
    %223 = arith.mulf %219, %218 : vector<8x32xf32>
    %224 = arith.addf %222, %223 : vector<8x32xf32>
    %225 = math.tanh %224 : vector<8x32xf32>
    %226 = arith.mulf %221, %225 : vector<8x32xf32>
    %227 = vector.extract_strided_slice %198 {offsets = [8, 0], sizes = [8, 128], strides = [1, 1]} : vector<64x256xf32> to vector<8x128xf32>
    %228 = vector.extract_strided_slice %201 {offsets = [48, 0], sizes = [8, 128], strides = [1, 1]} : vector<64x256xf32> to vector<8x128xf32>
    %229 = arith.addf %227, %228 : vector<8x128xf32>
    %cst_68 = arith.constant dense<0.000000e+00> : vector<8x128xf32>
    %230 = tpu.matmul %226, %5, %cst_68 {dimension_numbers = #tpu.dot_dimension_numbers<[1], [0], [0], [1], [0, 0, 1, 1], [], []>} : vector<8x32xf32>, vector<32x128xf32>, vector<8x128xf32> -> vector<8x128xf32>
    %231 = arith.addf %229, %230 : vector<8x128xf32>
    %232 = vector.extract_strided_slice %231 {offsets = [0, 0], sizes = [8, 96], strides = [1, 1]} : vector<8x128xf32> to vector<8x96xf32>
    %cst_69 = arith.constant 5.000000e-01 : f32
    %233 = vector.broadcast %cst_69 : f32 to vector<8x96xf32>
    %234 = arith.mulf %233, %232 : vector<8x96xf32>
    %235 = math.tanh %234 : vector<8x96xf32>
    %cst_70 = arith.constant 5.000000e-01 : f32
    %236 = vector.broadcast %cst_70 : f32 to vector<8x96xf32>
    %237 = arith.mulf %236, %235 : vector<8x96xf32>
    %cst_71 = arith.constant 5.000000e-01 : f32
    %238 = vector.broadcast %cst_71 : f32 to vector<8x96xf32>
    %239 = arith.addf %237, %238 : vector<8x96xf32>
    %240 = vector.extract_strided_slice %231 {offsets = [0, 96], sizes = [8, 32], strides = [1, 1]} : vector<8x128xf32> to vector<8x32xf32>
    %241 = math.tanh %240 : vector<8x32xf32>
    %242 = vector.extract_strided_slice %239 {offsets = [0, 0], sizes = [8, 32], strides = [1, 1]} : vector<8x96xf32> to vector<8x32xf32>
    %243 = vector.extract_strided_slice %239 {offsets = [0, 32], sizes = [8, 32], strides = [1, 1]} : vector<8x96xf32> to vector<8x32xf32>
    %244 = vector.extract_strided_slice %239 {offsets = [0, 64], sizes = [8, 32], strides = [1, 1]} : vector<8x96xf32> to vector<8x32xf32>
    %245 = arith.mulf %243, %224 : vector<8x32xf32>
    %246 = arith.mulf %242, %241 : vector<8x32xf32>
    %247 = arith.addf %245, %246 : vector<8x32xf32>
    %248 = math.tanh %247 : vector<8x32xf32>
    %249 = arith.mulf %244, %248 : vector<8x32xf32>
    %250 = vector.extract_strided_slice %198 {offsets = [16, 0], sizes = [8, 128], strides = [1, 1]} : vector<64x256xf32> to vector<8x128xf32>
    %251 = vector.extract_strided_slice %201 {offsets = [40, 0], sizes = [8, 128], strides = [1, 1]} : vector<64x256xf32> to vector<8x128xf32>
    %252 = arith.addf %250, %251 : vector<8x128xf32>
    %cst_72 = arith.constant dense<0.000000e+00> : vector<8x128xf32>
    %253 = tpu.matmul %249, %5, %cst_72 {dimension_numbers = #tpu.dot_dimension_numbers<[1], [0], [0], [1], [0, 0, 1, 1], [], []>} : vector<8x32xf32>, vector<32x128xf32>, vector<8x128xf32> -> vector<8x128xf32>
    %254 = arith.addf %252, %253 : vector<8x128xf32>
    %255 = vector.extract_strided_slice %254 {offsets = [0, 0], sizes = [8, 96], strides = [1, 1]} : vector<8x128xf32> to vector<8x96xf32>
    %cst_73 = arith.constant 5.000000e-01 : f32
    %256 = vector.broadcast %cst_73 : f32 to vector<8x96xf32>
    %257 = arith.mulf %256, %255 : vector<8x96xf32>
    %258 = math.tanh %257 : vector<8x96xf32>
    %cst_74 = arith.constant 5.000000e-01 : f32
    %259 = vector.broadcast %cst_74 : f32 to vector<8x96xf32>
    %260 = arith.mulf %259, %258 : vector<8x96xf32>
    %cst_75 = arith.constant 5.000000e-01 : f32
    %261 = vector.broadcast %cst_75 : f32 to vector<8x96xf32>
    %262 = arith.addf %260, %261 : vector<8x96xf32>
    %263 = vector.extract_strided_slice %254 {offsets = [0, 96], sizes = [8, 32], strides = [1, 1]} : vector<8x128xf32> to vector<8x32xf32>
    %264 = math.tanh %263 : vector<8x32xf32>
    %265 = vector.extract_strided_slice %262 {offsets = [0, 0], sizes = [8, 32], strides = [1, 1]} : vector<8x96xf32> to vector<8x32xf32>
    %266 = vector.extract_strided_slice %262 {offsets = [0, 32], sizes = [8, 32], strides = [1, 1]} : vector<8x96xf32> to vector<8x32xf32>
    %267 = vector.extract_strided_slice %262 {offsets = [0, 64], sizes = [8, 32], strides = [1, 1]} : vector<8x96xf32> to vector<8x32xf32>
    %268 = arith.mulf %266, %247 : vector<8x32xf32>
    %269 = arith.mulf %265, %264 : vector<8x32xf32>
    %270 = arith.addf %268, %269 : vector<8x32xf32>
    %271 = math.tanh %270 : vector<8x32xf32>
    %272 = arith.mulf %267, %271 : vector<8x32xf32>
    %273 = vector.extract_strided_slice %198 {offsets = [24, 0], sizes = [8, 128], strides = [1, 1]} : vector<64x256xf32> to vector<8x128xf32>
    %274 = vector.extract_strided_slice %201 {offsets = [32, 0], sizes = [8, 128], strides = [1, 1]} : vector<64x256xf32> to vector<8x128xf32>
    %275 = arith.addf %273, %274 : vector<8x128xf32>
    %cst_76 = arith.constant dense<0.000000e+00> : vector<8x128xf32>
    %276 = tpu.matmul %272, %5, %cst_76 {dimension_numbers = #tpu.dot_dimension_numbers<[1], [0], [0], [1], [0, 0, 1, 1], [], []>} : vector<8x32xf32>, vector<32x128xf32>, vector<8x128xf32> -> vector<8x128xf32>
    %277 = arith.addf %275, %276 : vector<8x128xf32>
    %278 = vector.extract_strided_slice %277 {offsets = [0, 0], sizes = [8, 96], strides = [1, 1]} : vector<8x128xf32> to vector<8x96xf32>
    %cst_77 = arith.constant 5.000000e-01 : f32
    %279 = vector.broadcast %cst_77 : f32 to vector<8x96xf32>
    %280 = arith.mulf %279, %278 : vector<8x96xf32>
    %281 = math.tanh %280 : vector<8x96xf32>
    %cst_78 = arith.constant 5.000000e-01 : f32
    %282 = vector.broadcast %cst_78 : f32 to vector<8x96xf32>
    %283 = arith.mulf %282, %281 : vector<8x96xf32>
    %cst_79 = arith.constant 5.000000e-01 : f32
    %284 = vector.broadcast %cst_79 : f32 to vector<8x96xf32>
    %285 = arith.addf %283, %284 : vector<8x96xf32>
    %286 = vector.extract_strided_slice %277 {offsets = [0, 96], sizes = [8, 32], strides = [1, 1]} : vector<8x128xf32> to vector<8x32xf32>
    %287 = math.tanh %286 : vector<8x32xf32>
    %288 = vector.extract_strided_slice %285 {offsets = [0, 0], sizes = [8, 32], strides = [1, 1]} : vector<8x96xf32> to vector<8x32xf32>
    %289 = vector.extract_strided_slice %285 {offsets = [0, 32], sizes = [8, 32], strides = [1, 1]} : vector<8x96xf32> to vector<8x32xf32>
    %290 = vector.extract_strided_slice %285 {offsets = [0, 64], sizes = [8, 32], strides = [1, 1]} : vector<8x96xf32> to vector<8x32xf32>
    %291 = arith.mulf %289, %270 : vector<8x32xf32>
    %292 = arith.mulf %288, %287 : vector<8x32xf32>
    %293 = arith.addf %291, %292 : vector<8x32xf32>
    %294 = math.tanh %293 : vector<8x32xf32>
    %295 = arith.mulf %290, %294 : vector<8x32xf32>
    %296 = vector.extract_strided_slice %198 {offsets = [32, 0], sizes = [8, 128], strides = [1, 1]} : vector<64x256xf32> to vector<8x128xf32>
    %297 = vector.extract_strided_slice %201 {offsets = [24, 0], sizes = [8, 128], strides = [1, 1]} : vector<64x256xf32> to vector<8x128xf32>
    %298 = arith.addf %296, %297 : vector<8x128xf32>
    %cst_80 = arith.constant dense<0.000000e+00> : vector<8x128xf32>
    %299 = tpu.matmul %295, %5, %cst_80 {dimension_numbers = #tpu.dot_dimension_numbers<[1], [0], [0], [1], [0, 0, 1, 1], [], []>} : vector<8x32xf32>, vector<32x128xf32>, vector<8x128xf32> -> vector<8x128xf32>
    %300 = arith.addf %298, %299 : vector<8x128xf32>
    %301 = vector.extract_strided_slice %300 {offsets = [0, 0], sizes = [8, 96], strides = [1, 1]} : vector<8x128xf32> to vector<8x96xf32>
    %cst_81 = arith.constant 5.000000e-01 : f32
    %302 = vector.broadcast %cst_81 : f32 to vector<8x96xf32>
    %303 = arith.mulf %302, %301 : vector<8x96xf32>
    %304 = math.tanh %303 : vector<8x96xf32>
    %cst_82 = arith.constant 5.000000e-01 : f32
    %305 = vector.broadcast %cst_82 : f32 to vector<8x96xf32>
    %306 = arith.mulf %305, %304 : vector<8x96xf32>
    %cst_83 = arith.constant 5.000000e-01 : f32
    %307 = vector.broadcast %cst_83 : f32 to vector<8x96xf32>
    %308 = arith.addf %306, %307 : vector<8x96xf32>
    %309 = vector.extract_strided_slice %300 {offsets = [0, 96], sizes = [8, 32], strides = [1, 1]} : vector<8x128xf32> to vector<8x32xf32>
    %310 = math.tanh %309 : vector<8x32xf32>
    %311 = vector.extract_strided_slice %308 {offsets = [0, 0], sizes = [8, 32], strides = [1, 1]} : vector<8x96xf32> to vector<8x32xf32>
    %312 = vector.extract_strided_slice %308 {offsets = [0, 32], sizes = [8, 32], strides = [1, 1]} : vector<8x96xf32> to vector<8x32xf32>
    %313 = vector.extract_strided_slice %308 {offsets = [0, 64], sizes = [8, 32], strides = [1, 1]} : vector<8x96xf32> to vector<8x32xf32>
    %314 = arith.mulf %312, %293 : vector<8x32xf32>
    %315 = arith.mulf %311, %310 : vector<8x32xf32>
    %316 = arith.addf %314, %315 : vector<8x32xf32>
    %317 = math.tanh %316 : vector<8x32xf32>
    %318 = arith.mulf %313, %317 : vector<8x32xf32>
    %319 = vector.extract_strided_slice %198 {offsets = [40, 0], sizes = [8, 128], strides = [1, 1]} : vector<64x256xf32> to vector<8x128xf32>
    %320 = vector.extract_strided_slice %201 {offsets = [16, 0], sizes = [8, 128], strides = [1, 1]} : vector<64x256xf32> to vector<8x128xf32>
    %321 = arith.addf %319, %320 : vector<8x128xf32>
    %cst_84 = arith.constant dense<0.000000e+00> : vector<8x128xf32>
    %322 = tpu.matmul %318, %5, %cst_84 {dimension_numbers = #tpu.dot_dimension_numbers<[1], [0], [0], [1], [0, 0, 1, 1], [], []>} : vector<8x32xf32>, vector<32x128xf32>, vector<8x128xf32> -> vector<8x128xf32>
    %323 = arith.addf %321, %322 : vector<8x128xf32>
    %324 = vector.extract_strided_slice %323 {offsets = [0, 0], sizes = [8, 96], strides = [1, 1]} : vector<8x128xf32> to vector<8x96xf32>
    %cst_85 = arith.constant 5.000000e-01 : f32
    %325 = vector.broadcast %cst_85 : f32 to vector<8x96xf32>
    %326 = arith.mulf %325, %324 : vector<8x96xf32>
    %327 = math.tanh %326 : vector<8x96xf32>
    %cst_86 = arith.constant 5.000000e-01 : f32
    %328 = vector.broadcast %cst_86 : f32 to vector<8x96xf32>
    %329 = arith.mulf %328, %327 : vector<8x96xf32>
    %cst_87 = arith.constant 5.000000e-01 : f32
    %330 = vector.broadcast %cst_87 : f32 to vector<8x96xf32>
    %331 = arith.addf %329, %330 : vector<8x96xf32>
    %332 = vector.extract_strided_slice %323 {offsets = [0, 96], sizes = [8, 32], strides = [1, 1]} : vector<8x128xf32> to vector<8x32xf32>
    %333 = math.tanh %332 : vector<8x32xf32>
    %334 = vector.extract_strided_slice %331 {offsets = [0, 0], sizes = [8, 32], strides = [1, 1]} : vector<8x96xf32> to vector<8x32xf32>
    %335 = vector.extract_strided_slice %331 {offsets = [0, 32], sizes = [8, 32], strides = [1, 1]} : vector<8x96xf32> to vector<8x32xf32>
    %336 = vector.extract_strided_slice %331 {offsets = [0, 64], sizes = [8, 32], strides = [1, 1]} : vector<8x96xf32> to vector<8x32xf32>
    %337 = arith.mulf %335, %316 : vector<8x32xf32>
    %338 = arith.mulf %334, %333 : vector<8x32xf32>
    %339 = arith.addf %337, %338 : vector<8x32xf32>
    %340 = math.tanh %339 : vector<8x32xf32>
    %341 = arith.mulf %336, %340 : vector<8x32xf32>
    %342 = vector.extract_strided_slice %198 {offsets = [48, 0], sizes = [8, 128], strides = [1, 1]} : vector<64x256xf32> to vector<8x128xf32>
    %343 = vector.extract_strided_slice %201 {offsets = [8, 0], sizes = [8, 128], strides = [1, 1]} : vector<64x256xf32> to vector<8x128xf32>
    %344 = arith.addf %342, %343 : vector<8x128xf32>
    %cst_88 = arith.constant dense<0.000000e+00> : vector<8x128xf32>
    %345 = tpu.matmul %341, %5, %cst_88 {dimension_numbers = #tpu.dot_dimension_numbers<[1], [0], [0], [1], [0, 0, 1, 1], [], []>} : vector<8x32xf32>, vector<32x128xf32>, vector<8x128xf32> -> vector<8x128xf32>
    %346 = arith.addf %344, %345 : vector<8x128xf32>
    %347 = vector.extract_strided_slice %346 {offsets = [0, 0], sizes = [8, 96], strides = [1, 1]} : vector<8x128xf32> to vector<8x96xf32>
    %cst_89 = arith.constant 5.000000e-01 : f32
    %348 = vector.broadcast %cst_89 : f32 to vector<8x96xf32>
    %349 = arith.mulf %348, %347 : vector<8x96xf32>
    %350 = math.tanh %349 : vector<8x96xf32>
    %cst_90 = arith.constant 5.000000e-01 : f32
    %351 = vector.broadcast %cst_90 : f32 to vector<8x96xf32>
    %352 = arith.mulf %351, %350 : vector<8x96xf32>
    %cst_91 = arith.constant 5.000000e-01 : f32
    %353 = vector.broadcast %cst_91 : f32 to vector<8x96xf32>
    %354 = arith.addf %352, %353 : vector<8x96xf32>
    %355 = vector.extract_strided_slice %346 {offsets = [0, 96], sizes = [8, 32], strides = [1, 1]} : vector<8x128xf32> to vector<8x32xf32>
    %356 = math.tanh %355 : vector<8x32xf32>
    %357 = vector.extract_strided_slice %354 {offsets = [0, 0], sizes = [8, 32], strides = [1, 1]} : vector<8x96xf32> to vector<8x32xf32>
    %358 = vector.extract_strided_slice %354 {offsets = [0, 32], sizes = [8, 32], strides = [1, 1]} : vector<8x96xf32> to vector<8x32xf32>
    %359 = vector.extract_strided_slice %354 {offsets = [0, 64], sizes = [8, 32], strides = [1, 1]} : vector<8x96xf32> to vector<8x32xf32>
    %360 = arith.mulf %358, %339 : vector<8x32xf32>
    %361 = arith.mulf %357, %356 : vector<8x32xf32>
    %362 = arith.addf %360, %361 : vector<8x32xf32>
    %363 = math.tanh %362 : vector<8x32xf32>
    %364 = arith.mulf %359, %363 : vector<8x32xf32>
    %365 = vector.extract_strided_slice %198 {offsets = [56, 0], sizes = [8, 128], strides = [1, 1]} : vector<64x256xf32> to vector<8x128xf32>
    %366 = vector.extract_strided_slice %201 {offsets = [0, 0], sizes = [8, 128], strides = [1, 1]} : vector<64x256xf32> to vector<8x128xf32>
    %367 = arith.addf %365, %366 : vector<8x128xf32>
    %cst_92 = arith.constant dense<0.000000e+00> : vector<8x128xf32>
    %368 = tpu.matmul %364, %5, %cst_92 {dimension_numbers = #tpu.dot_dimension_numbers<[1], [0], [0], [1], [0, 0, 1, 1], [], []>} : vector<8x32xf32>, vector<32x128xf32>, vector<8x128xf32> -> vector<8x128xf32>
    %369 = arith.addf %367, %368 : vector<8x128xf32>
    %370 = vector.extract_strided_slice %369 {offsets = [0, 0], sizes = [8, 96], strides = [1, 1]} : vector<8x128xf32> to vector<8x96xf32>
    %cst_93 = arith.constant 5.000000e-01 : f32
    %371 = vector.broadcast %cst_93 : f32 to vector<8x96xf32>
    %372 = arith.mulf %371, %370 : vector<8x96xf32>
    %373 = math.tanh %372 : vector<8x96xf32>
    %cst_94 = arith.constant 5.000000e-01 : f32
    %374 = vector.broadcast %cst_94 : f32 to vector<8x96xf32>
    %375 = arith.mulf %374, %373 : vector<8x96xf32>
    %cst_95 = arith.constant 5.000000e-01 : f32
    %376 = vector.broadcast %cst_95 : f32 to vector<8x96xf32>
    %377 = arith.addf %375, %376 : vector<8x96xf32>
    %378 = vector.extract_strided_slice %369 {offsets = [0, 96], sizes = [8, 32], strides = [1, 1]} : vector<8x128xf32> to vector<8x32xf32>
    %379 = math.tanh %378 : vector<8x32xf32>
    %380 = vector.extract_strided_slice %377 {offsets = [0, 0], sizes = [8, 32], strides = [1, 1]} : vector<8x96xf32> to vector<8x32xf32>
    %381 = vector.extract_strided_slice %377 {offsets = [0, 32], sizes = [8, 32], strides = [1, 1]} : vector<8x96xf32> to vector<8x32xf32>
    %382 = vector.extract_strided_slice %377 {offsets = [0, 64], sizes = [8, 32], strides = [1, 1]} : vector<8x96xf32> to vector<8x32xf32>
    %383 = arith.mulf %381, %362 : vector<8x32xf32>
    %384 = arith.mulf %380, %379 : vector<8x32xf32>
    %385 = arith.addf %383, %384 : vector<8x32xf32>
    %386 = math.tanh %385 : vector<8x32xf32>
    %387 = arith.mulf %382, %386 : vector<8x32xf32>
    %388 = vector.extract_strided_slice %198 {offsets = [56, 128], sizes = [8, 128], strides = [1, 1]} : vector<64x256xf32> to vector<8x128xf32>
    %389 = vector.extract_strided_slice %201 {offsets = [0, 128], sizes = [8, 128], strides = [1, 1]} : vector<64x256xf32> to vector<8x128xf32>
    %390 = arith.addf %388, %389 : vector<8x128xf32>
    %391 = vector.extract_strided_slice %390 {offsets = [0, 0], sizes = [8, 96], strides = [1, 1]} : vector<8x128xf32> to vector<8x96xf32>
    %cst_96 = arith.constant 5.000000e-01 : f32
    %392 = vector.broadcast %cst_96 : f32 to vector<8x96xf32>
    %393 = arith.mulf %392, %391 : vector<8x96xf32>
    %394 = math.tanh %393 : vector<8x96xf32>
    %cst_97 = arith.constant 5.000000e-01 : f32
    %395 = vector.broadcast %cst_97 : f32 to vector<8x96xf32>
    %396 = arith.mulf %395, %394 : vector<8x96xf32>
    %cst_98 = arith.constant 5.000000e-01 : f32
    %397 = vector.broadcast %cst_98 : f32 to vector<8x96xf32>
    %398 = arith.addf %396, %397 : vector<8x96xf32>
    %399 = vector.extract_strided_slice %398 {offsets = [0, 0], sizes = [8, 32], strides = [1, 1]} : vector<8x96xf32> to vector<8x32xf32>
    %400 = vector.extract_strided_slice %398 {offsets = [0, 64], sizes = [8, 32], strides = [1, 1]} : vector<8x96xf32> to vector<8x32xf32>
    %401 = vector.extract_strided_slice %390 {offsets = [0, 96], sizes = [8, 32], strides = [1, 1]} : vector<8x128xf32> to vector<8x32xf32>
    %402 = math.tanh %401 : vector<8x32xf32>
    %403 = arith.mulf %399, %402 : vector<8x32xf32>
    %404 = math.tanh %403 : vector<8x32xf32>
    %405 = arith.mulf %400, %404 : vector<8x32xf32>
    %cst_99 = arith.constant dense<0.000000e+00> : vector<8x32xf32>
    %406 = tpu.matmul %387, %6, %cst_99 {dimension_numbers = #tpu.dot_dimension_numbers<[1], [0], [0], [1], [0, 0, 1, 1], [], []>} : vector<8x32xf32>, vector<32x32xf32>, vector<8x32xf32> -> vector<8x32xf32>
    %cst_100 = arith.constant dense<0.000000e+00> : vector<8x32xf32>
    %407 = tpu.matmul %405, %7, %cst_100 {dimension_numbers = #tpu.dot_dimension_numbers<[1], [0], [0], [1], [0, 0, 1, 1], [], []>} : vector<8x32xf32>, vector<32x32xf32>, vector<8x32xf32> -> vector<8x32xf32>
    %408 = arith.addf %406, %407 : vector<8x32xf32>
    %409 = vector.broadcast %8 : vector<1x32xf32> to vector<8x32xf32>
    %410 = arith.addf %408, %409 : vector<8x32xf32>
    %cst_101 = arith.constant 0.000000e+00 : f32
    %411 = vector.broadcast %cst_101 : f32 to vector<8x32xf32>
    %412 = arith.maximumf %410, %411 : vector<8x32xf32>
    %cst_102 = arith.constant dense<0.000000e+00> : vector<8x64xf32>
    %413 = tpu.matmul %412, %9, %cst_102 {dimension_numbers = #tpu.dot_dimension_numbers<[1], [0], [0], [1], [0, 0, 1, 1], [], []>} : vector<8x32xf32>, vector<32x64xf32>, vector<8x64xf32> -> vector<8x64xf32>
    %414 = vector.broadcast %10 : vector<1x64xf32> to vector<8x64xf32>
    %415 = arith.addf %413, %414 : vector<8x64xf32>
    %416 = tpu.concatenate %387, %405, %415 in 1 : vector<8x32xf32>, vector<8x32xf32>, vector<8x64xf32> -> vector<8x128xf32>
    %c0_103 = arith.constant 0 : index
    %c0_104 = arith.constant 0 : index
    %417 = vector.load %arg2[%c0_103, %c0_104] : memref<8x128xf32, #tpu.memory_space<vmem>>, vector<8x128xf32>
    tpu.vector_store %arg2[%c0_103, %c0_104], %416 {strides = array<i32>} : memref<8x128xf32, #tpu.memory_space<vmem>>, vector<8x128xf32>,
    return
  }
}

</mosaic_0001>

<bundles_post_ra>
// kernel: tpu_custom_call.1
= control target key start
LH: loop header
LB: loop body
LE: loop exit
PB: predicated region body
PF: predicated region fallthrough
CT: control target
= control target key end

     0   :  { %7 = vsyncpa [#allocation4], 0  ;;  %s2273_s0 = inlined_call_operand.vmem [shape: f32[64,32], index: 0, kind: input, shape index: {}]   ;;  %s2274_s1 = inlined_call_operand.hbm [shape: f32[320,256], index: 1, kind: input, shape index: {}]   ;;  %s2275_s2 = inlined_call_operand.hbm [shape: f32[8,128], index: 2, kind: output, shape index: {}]  }
   0x1   :  { %8 = vsyncpa [#allocation5], 0  ;;  %s15_s11 = sshll.u32 %s2274_s1, 4  ;;  %s1765_s12 = smov [#allocation3]   ;;  %s16_s11 = int_to_ptr.hbm [resolvable:$true] %s15_s11 }
   0x2   :  { %s17_s13 = sshll.u32 %s1765_s12, 4  ;;  %s1766_s14 = smov 256   ;;  %s18_s13 = int_to_ptr.vmem [resolvable:$true] %s17_s13 }
   0x3   :  { %s1767_s15 = smov 16  }
   0x4   :  { %23 = dma.hbm_to_vmem [thread:$0]  %s16_s11, 10240, %s18_s13, [#allocation4], %s1766_s14, %s1766_s14, %s1767_s15  }
   0x5   :  { %1761 = dma.done.wait [#allocation4], 10240  }
   0x6   :  { %1762 = vsyncadd [#allocation4], 4294957056  ;;  %v1791_v0 = vld [vmem:[#allocation3 + $0xc8] sm:$0xff]  ;;  %v1793_v1 = vld [vmem:[#allocation3 + $0xb8] sm:$0xff]  ;;  %vm103_vm0 = vcmask 261120   ;;  %v1768_v24 = vmov 0.0  }
   0x7   :  { %242 = vmatpush.msra.mxu3 %v1791_v0  ;;  %v1796_v2 = vld [vmem:[#allocation3 + $0xa8] sm:$0xff]  ;;  %v35_v3 = vld [vmem:[#allocation3 + $0x38] sm:$0xff]  ;;  %v1801_v7 = vld [vmem:[#allocation3 + $0xc0] sm:$0xff]  ;;  %s1769_s17 = smov 64   ;;  %vm210_vm1 = vcmask 523264   ;;  %s1771_s4 = smov 32  }
   0x8   :  { %v33_v4 = vld [vmem:[#allocation3 + $0x28] sm:$0xff]  ;;  %181 = vmatpush.msra.mxu1 %v35_v3  ;;  %v1799_v5 = vld [vmem:[#allocation3 + $0x98] sm:$0xff]  ;;  %v1804_v8 = vld [vmem:[#allocation3 + $0xb0] sm:$0xff]  ;;  %222 = vmatpush.msra.mxu2 %v1801_v7  ;;  %s1772_s5 = smov [#allocation6]   ;;  %s1505_s9 = sshll.u32 %s2275_s2, 4  ;;  %s1506_s9 = int_to_ptr.hbm [resolvable:$true] %s1505_s9 }
   0x9   :  { %243 = vmatpush.msra.mxu3 %v1793_v1  ;;  %v31_v6 = vld [vmem:[#allocation3 + $0x18] sm:$0xff]  ;;  %v1806_v9 = vld [vmem:[#allocation3 + $0x88] sm:$0xff]  ;;  %v34_v11 = vld [vmem:[#allocation3 + $0x30] sm:$0xff]  ;;  %s1503_s6 = sshll.u32 %s1772_s5, 4  ;;  %s1504_s6 = int_to_ptr.vmem [resolvable:$true] %s1503_s6 }
   0xa   :  { %182 = vmatpush.msra.mxu1 %v33_v4  ;;  %v29_v10 = vld [vmem:[#allocation3 + $0x8] sm:$0xff]  ;;  %v90_v12 = vld [vmem:[%s2273_s0] sm:$0xff]  ;;  %v1815_v14 = vld [vmem:[#allocation3 + $0x78] sm:$0xff]  ;;  %223 = vmatpush.msra.mxu2 %v1804_v8 }
   0xb   :  { %244 = vmatpush.msra.mxu3 %v1796_v2  ;;  %v1813_v13 = vld [vmem:[#allocation3 + $0xa0] sm:$0xff]  ;;  %140 = vmatpush.msra.mxu0 %v34_v11  ;;  %v1819_v16 = vld [vmem:[#allocation3 + $0x90] sm:$0xff]  ;;  %v1821_v17 = vld [vmem:[#allocation3 + $0x68] sm:$0xff] }
   0xc   :  { %183 = vmatpush.msra.mxu1 %v31_v6  ;;  %v32_v15 = vld [vmem:[#allocation3 + $0x20] sm:$0xff]  ;;  %224 = vmatpush.msra.mxu2 %v1813_v13  ;;  %v30_v18 = vld [vmem:[#allocation3 + $0x10] sm:$0xff]  ;;  %v1828_v20 = vld [vmem:[#allocation3 + $0x58] sm:$0xff] }
   0xd   :  { %245 = vmatpush.msra.mxu3 %v1799_v5  ;;  %v1826_v19 = vld [vmem:[#allocation3 + $0x80] sm:$0xff]  ;;  %141 = vmatpush.msra.mxu0 %v32_v15  ;;  %v1833_v22 = vld [vmem:[#allocation3 + $0x70] sm:$0xff]  ;;  %v91_v48 = vld [vmem:[%s2273_s0 + $0x8] sm:$0xff] }
   0xe   :  { %184 = vmatpush.msra.mxu1 %v29_v10  ;;  %225 = vmatpush.msra.mxu2 %v1819_v16  ;;  %v28_v21 = vld [vmem:[#allocation3] sm:$0xff]  ;;  %v1842_v25 = vld [vmem:[#allocation3 + $0x50] sm:$0xff] }
   0xf   :  { %246 = vmatpush.msra.mxu3 %v1806_v9  ;;  %1523 = vmatmul.msk.f32.vlgmr.msra.gmra.mxu1 %vm103_vm0, %v90_v12  ;;  %v1838_v23 = vld [vmem:[#allocation3 + $0x60] sm:$0xff] }
  0x10   :  { %530 = vmatpush.msrb.mxu1 %v1791_v0  ;;  %142 = vmatpush.msra.mxu0 %v30_v18  ;;  %v37_v26 = vld [vmem:[#allocation3 + $0x40] ss:$8 sm:$0x3] }
  0x11   :  { %247 = vmatpush.msra.mxu3 %v1815_v14  ;;  %226 = vmatpush.msra.mxu2 %v1826_v19  ;;  %v1910_v27 = vperm.slane %v37_v26, 1  ;;  %v1914_v33 = vperm.slane %v37_v26, 0 }
  0x12   :  { %531 = vmatpush.msrb.mxu1 %v1793_v1  ;;  %143 = vmatpush.msra.mxu0 %v28_v21 }
  0x13   :  { %248 = vmatpush.msra.mxu3 %v1821_v17  ;;  %227 = vmatpush.msra.mxu2 %v1833_v22 }
  0x14   :  { %1515 = vmatmul.msk.f32.vlgmr.msra.gmra.mxu0 %vm103_vm0, %v90_v12  ;;  %532 = vmatpush.msrb.mxu1 %v1796_v2 }
  0x15   :  { %249 = vmatpush.msra.mxu3 %v1828_v20  ;;  %228 = vmatpush.msra.mxu2 %v1838_v23 }
  0x16   :  { %250 = vmatmul.f32.vlgmr.msra.gmra.mxu3 %v1768_v24  ;;  %510 = vmatpush.msrb.mxu0 %v1801_v7 }
  0x17   :  { %314 = vmatpush.msrb.mxu3 %v1791_v0  ;;  %229 = vmatpush.msra.mxu2 %v1842_v25 }
  0x18   :  { %533 = vmatpush.msrb.mxu1 %v1799_v5  ;;  %230 = vmatmul.f32.vlgmr.msra.gmra.mxu2 %v1768_v24 }
  0x19   :  { %315 = vmatpush.msrb.mxu3 %v1793_v1  ;;  %294 = vmatpush.msrb.mxu2 %v1801_v7 }
  0x1a   :  { %534 = vmatpush.msrb.mxu1 %v1806_v9  ;;  %511 = vmatpush.msrb.mxu0 %v1804_v8 }
  0x1b   :  { %316 = vmatpush.msrb.mxu3 %v1796_v2  ;;  %295 = vmatpush.msrb.mxu2 %v1804_v8 }
  0x1c   :  { %535 = vmatpush.msrb.mxu1 %v1815_v14  ;;  %512 = vmatpush.msrb.mxu0 %v1813_v13 }
  0x1d   :  { %317 = vmatpush.msrb.mxu3 %v1799_v5  ;;  %296 = vmatpush.msrb.mxu2 %v1813_v13 }
  0x1e   :  { %536 = vmatpush.msrb.mxu1 %v1821_v17  ;;  %513 = vmatpush.msrb.mxu0 %v1819_v16 }
  0x1f   :  { %318 = vmatpush.msrb.mxu3 %v1806_v9  ;;  %297 = vmatpush.msrb.mxu2 %v1819_v16 }
  0x20   :  { %537 = vmatpush.msrb.mxu1 %v1828_v20  ;;  %514 = vmatpush.msrb.mxu0 %v1826_v19 }
  0x21   :  { %319 = vmatpush.msrb.mxu3 %v1815_v14  ;;  %298 = vmatpush.msrb.mxu2 %v1826_v19 }
  0x22   :  { %674 = vmatpush.msra.mxu1 %v1791_v0  ;;  %515 = vmatpush.msrb.mxu0 %v1833_v22 }
  0x23   :  { %320 = vmatpush.msrb.mxu3 %v1821_v17  ;;  %299 = vmatpush.msrb.mxu2 %v1833_v22 }
  0x24   :  { %516 = vmatpush.msrb.mxu0 %v1838_v23  ;;  %675 = vmatpush.msra.mxu1 %v1793_v1 }
  0x25   :  { %321 = vmatpush.msrb.mxu3 %v1828_v20  ;;  %300 = vmatpush.msrb.mxu2 %v1838_v23 }
  0x26   :  { %517 = vmatpush.msrb.mxu0 %v1842_v25  ;;  %676 = vmatpush.msra.mxu1 %v1796_v2 }
  0x27   :  { %386 = vmatpush.msra.mxu3 %v1791_v0  ;;  %301 = vmatpush.msrb.mxu2 %v1842_v25 }
  0x28   :  { %654 = vmatpush.msra.mxu0 %v1801_v7  ;;  %677 = vmatpush.msra.mxu1 %v1799_v5 }
  0x29   :  { %387 = vmatpush.msra.mxu3 %v1793_v1  ;;  %366 = vmatpush.msra.mxu2 %v1801_v7 }
  0x2a   :  { %655 = vmatpush.msra.mxu0 %v1804_v8  ;;  %678 = vmatpush.msra.mxu1 %v1806_v9 }
  0x2b   :  { %388 = vmatpush.msra.mxu3 %v1796_v2  ;;  %367 = vmatpush.msra.mxu2 %v1804_v8 }
  0x2c   :  { %656 = vmatpush.msra.mxu0 %v1813_v13  ;;  %679 = vmatpush.msra.mxu1 %v1815_v14 }
  0x2d   :  { %389 = vmatpush.msra.mxu3 %v1799_v5  ;;  %368 = vmatpush.msra.mxu2 %v1813_v13 }
  0x2e   :  { %657 = vmatpush.msra.mxu0 %v1819_v16  ;;  %680 = vmatpush.msra.mxu1 %v1821_v17 }
  0x2f   :  { %390 = vmatpush.msra.mxu3 %v1806_v9  ;;  %369 = vmatpush.msra.mxu2 %v1819_v16 }
  0x30   :  { %658 = vmatpush.msra.mxu0 %v1826_v19  ;;  %681 = vmatpush.msra.mxu1 %v1828_v20 }
  0x31   :  { %391 = vmatpush.msra.mxu3 %v1815_v14  ;;  %370 = vmatpush.msra.mxu2 %v1826_v19 }
  0x32   :  { %659 = vmatpush.msra.mxu0 %v1833_v22  ;;  %1524 = vmatmul.msk.f32.gmra.mxu1 %vm103_vm0, %v91_v48 }
  0x33   :  { %392 = vmatpush.msra.mxu3 %v1821_v17  ;;  %371 = vmatpush.msra.mxu2 %v1833_v22 }
  0x34   :  { %660 = vmatpush.msra.mxu0 %v1838_v23 }
  0x35   :  { %393 = vmatpush.msra.mxu3 %v1828_v20  ;;  %372 = vmatpush.msra.mxu2 %v1838_v23 }
  0x36   :  { %661 = vmatpush.msra.mxu0 %v1842_v25 }
  0x37   :  { %373 = vmatpush.msra.mxu2 %v1842_v25  ;;  %1516 = vmatmul.msk.f32.gmra.mxu0 %vm103_vm0, %v91_v48 }
  0x8c   :  { %v186_v28 = vpop.f32.mrf.mxu1 }
  0x8d   :  { %v187_v29 = vadd.f32 %v186_v28, %v1910_v27  ;;  %v92_v28 = vld [vmem:[%s2273_s0 + $0x10] sm:$0xff] }
  0x8e   :  { %1517 = vmatmul.msk.f32.gmra.mxu0 %vm103_vm0, %v92_v28  ;;  %1525 = vmatmul.msk.f32.gmra.mxu1 %vm103_vm0, %v92_v28 }
  0x91   :  { %v145_v34 = vpop.f32.mrf.mxu0 }
  0x92   :  { %v146_v35 = vadd.f32 %v145_v34, %v1914_v33 }
  0x99   :  { %v251_v30 = vpop.f32.mrf.mxu3 }
  0x9a   :  { %v255_v31 = vadd.f32 %v251_v30, %v187_v29 }
  0x9b   :  { %v231_v36 = vpop.f32.mrf.mxu2 }
  0x9c   :  { %1595 = vtanh.f32 %v255_v31  ;;  %v254_v37 = vadd.f32 %v231_v36, %v146_v35  ;;  %v257_v49 = vmul.f32 0.5, %v255_v31 }
  0x9e   :  { %v256_v38 = vmul.f32 0.5, %v254_v37 }
  0xa0   :  { %1597 = vtanh.f32 %v256_v38 }
  0xa2   :  { %v1596_v32 = vpop.eup %1595 }
  0xa3   :  { %267 = vrot.lane.b32.xlu0 %v1596_v32, %s1769_s17 }
  0xa6   :  { %v1598_v39 = vpop.eup %1597 }
  0xa7   :  { %v260_v40 = vmul.f32 0.5, %v1598_v39 }
  0xa9   :  { %v262_v41 = vadd.f32 0.5, %v260_v40 }
  0xab   :  { %v265_v44 = vmul.f32 0.0, %v262_v41 }
  0xaf   :  { %v189_v55 = vpop.f32.mrf.mxu1 }
  0xb0   :  { %v190_v56 = vadd.f32 %v189_v55, %v1910_v27  ;;  %v93_v55 = vld [vmem:[%s2273_s0 + $0x18] sm:$0xff] }
  0xb1   :  { %1518 = vmatmul.msk.f32.gmra.mxu0 %vm103_vm0, %v93_v55  ;;  %1526 = vmatmul.msk.f32.gmra.mxu1 %vm103_vm0, %v93_v55 }
  0xb4   :  { %v148_v60 = vpop.f32.mrf.mxu0 }
  0xb5   :  { %v149_v61 = vadd.f32 %v148_v60, %v1914_v33 }
 0x10b   :  { %v192_v36 = vpop.f32.mrf.mxu1 }
 0x10c   :  { %v193_v37 = vadd.f32 %v192_v36, %v1910_v27 }
 0x115   :  { %v268_v42 = vpop.permute.xlu0 %267 }
 0x116   :  { %v270_v43 = vmul.f32 %v268_v42, %v262_v41  ;;  %v151_v41 = vpop.f32.mrf.mxu0 }
 0x117   :  { %v152_v42 = vadd.f32 %v151_v41, %v1914_v33 }
 0x118   :  { %272 = vrot.lane.b32.xlu0 %v270_v43, %s1769_s17 }
 0x18a   :  { %v273_v45 = vpop.permute.xlu0 %272 }
 0x18b   :  { %v275_v46 = vadd.f32 %v273_v45, %v265_v44 }
 0x18d   :  { %1599 = vtanh.f32 %v275_v46 }
 0x18e   :  { %1601 = vtanh.f32 %v257_v49 }
 0x193   :  { %v1600_v47 = vpop.eup %1599 }
 0x194   :  { %278 = vrot.lane.b32.xlu1 %v1600_v47, %s1769_s17  ;;  %v1602_v50 = vpop.eup %1601 }
 0x195   :  { %v261_v51 = vmul.f32 0.5, %v1602_v50 }
 0x197   :  { %v263_v52 = vadd.f32 0.5, %v261_v51 }
 0x206   :  { %v279_v53 = vpop.permute.xlu1 %278 }
 0x207   :  { %v281_v54 = vmul.f32 %v279_v53, %v263_v52 }
 0x209   :  { %282 = vst.msk [vmem:[#allocation2] sm:$0xff] %vm210_vm1, %v281_v54  ;;  %1531 = vmatmul.msk.f32.vlgmr.msrb.gmra.mxu2 %vm210_vm1, %v281_v54  ;;  %1532 = vmatmul.msk.f32.vlgmr.msrb.gmra.mxu3 %vm210_vm1, %v281_v54 }
 0x20a   :  { %438 = vmatpush.msrb.mxu2 %v1801_v7  ;;  %458 = vmatpush.msrb.mxu3 %v1791_v0 }
 0x20c   :  { %439 = vmatpush.msrb.mxu2 %v1804_v8  ;;  %459 = vmatpush.msrb.mxu3 %v1793_v1 }
 0x20e   :  { %440 = vmatpush.msrb.mxu2 %v1813_v13  ;;  %460 = vmatpush.msrb.mxu3 %v1796_v2 }
 0x210   :  { %441 = vmatpush.msrb.mxu2 %v1819_v16  ;;  %461 = vmatpush.msrb.mxu3 %v1799_v5 }
 0x212   :  { %442 = vmatpush.msrb.mxu2 %v1826_v19  ;;  %462 = vmatpush.msrb.mxu3 %v1806_v9 }
 0x214   :  { %443 = vmatpush.msrb.mxu2 %v1833_v22  ;;  %463 = vmatpush.msrb.mxu3 %v1815_v14 }
 0x216   :  { %444 = vmatpush.msrb.mxu2 %v1838_v23  ;;  %464 = vmatpush.msrb.mxu3 %v1821_v17 }
 0x218   :  { %445 = vmatpush.msrb.mxu2 %v1842_v25  ;;  %465 = vmatpush.msrb.mxu3 %v1828_v20 }
 0x28c   :  { %v323_v57 = vpop.f32.mrf.mxu3  ;;  %v303_v62 = vpop.f32.mrf.mxu2 }
 0x28d   :  { %v327_v58 = vadd.f32 %v323_v57, %v190_v56  ;;  %v326_v63 = vadd.f32 %v303_v62, %v149_v61  ;;  %v95_v62 = vld [vmem:[%s2273_s0 + $0x28] sm:$0xff] }
 0x28f   :  { %1603 = vtanh.f32 %v327_v58  ;;  %v328_v3 = vmul.f32 0.5, %v326_v63  ;;  %v329_v29 = vmul.f32 0.5, %v327_v58  ;;  %v96_v63 = vld [vmem:[%s2273_s0 + $0x30] sm:$0xff] }
 0x291   :  { %1605 = vtanh.f32 %v328_v3 }
 0x295   :  { %v1604_v59 = vpop.eup %1603 }
 0x296   :  { %339 = vrot.lane.b32.xlu1 %v1604_v59, %s1769_s17 }
 0x297   :  { %v1606_v4 = vpop.eup %1605 }
 0x298   :  { %v332_v6 = vmul.f32 0.5, %v1606_v4 }
 0x29a   :  { %v334_v10 = vadd.f32 0.5, %v332_v6  ;;  %v97_v6 = vld [vmem:[%s2273_s0 + $0x38] sm:$0xff] }
 0x29c   :  { %v337_v15 = vmul.f32 %v334_v10, %v275_v46 }
 0x308   :  { %v340_v11 = vpop.permute.xlu1 %339 }
 0x309   :  { %v342_v12 = vmul.f32 %v340_v11, %v334_v10 }
 0x30b   :  { %344 = vrot.lane.b32.xlu2 %v342_v12, %s1769_s17 }
 0x365   :  { %v345_v18 = vpop.permute.xlu2 %344 }
 0x366   :  { %v347_v21 = vadd.f32 %v345_v18, %v337_v15 }
 0x368   :  { %1607 = vtanh.f32 %v347_v21 }
 0x369   :  { %1609 = vtanh.f32 %v329_v29 }
 0x36e   :  { %v1608_v26 = vpop.eup %1607 }
 0x36f   :  { %350 = vrot.lane.b32.xlu2 %v1608_v26, %s1769_s17  ;;  %v1610_v30 = vpop.eup %1609 }
 0x370   :  { %v333_v31 = vmul.f32 0.5, %v1610_v30 }
 0x372   :  { %v335_v32 = vadd.f32 0.5, %v333_v31 }
 0x3c9   :  { %v351_v34 = vpop.permute.xlu2 %350 }
 0x3ca   :  { %v353_v35 = vmul.f32 %v351_v34, %v335_v32 }
 0x3cc   :  { %354 = vst.msk [vmem:[#allocation2 + $0x8] sm:$0xff] %vm210_vm1, %v353_v35  ;;  %1533 = vmatmul.msk.f32.vlgmr.msra.gmra.mxu2 %vm210_vm1, %v353_v35  ;;  %1534 = vmatmul.msk.f32.vlgmr.msra.gmra.mxu3 %vm210_vm1, %v353_v35 }
 0x3cd   :  { %582 = vmatpush.msra.mxu2 %v1801_v7  ;;  %602 = vmatpush.msra.mxu3 %v1791_v0 }
 0x3cf   :  { %583 = vmatpush.msra.mxu2 %v1804_v8  ;;  %603 = vmatpush.msra.mxu3 %v1793_v1 }
 0x3d1   :  { %584 = vmatpush.msra.mxu2 %v1813_v13  ;;  %604 = vmatpush.msra.mxu3 %v1796_v2 }
 0x3d3   :  { %585 = vmatpush.msra.mxu2 %v1819_v16  ;;  %605 = vmatpush.msra.mxu3 %v1799_v5 }
 0x3d5   :  { %586 = vmatpush.msra.mxu2 %v1826_v19  ;;  %606 = vmatpush.msra.mxu3 %v1806_v9 }
 0x3d7   :  { %587 = vmatpush.msra.mxu2 %v1833_v22  ;;  %607 = vmatpush.msra.mxu3 %v1815_v14 }
 0x3d9   :  { %588 = vmatpush.msra.mxu2 %v1838_v23  ;;  %608 = vmatpush.msra.mxu3 %v1821_v17 }
 0x3db   :  { %589 = vmatpush.msra.mxu2 %v1842_v25  ;;  %609 = vmatpush.msra.mxu3 %v1828_v20 }
 0x44f   :  { %v395_v38 = vpop.f32.mrf.mxu3  ;;  %v375_v43 = vpop.f32.mrf.mxu2 }
 0x450   :  { %v399_v39 = vadd.f32 %v395_v38, %v193_v37  ;;  %v398_v44 = vadd.f32 %v375_v43, %v152_v42 }
 0x452   :  { %1611 = vtanh.f32 %v399_v39  ;;  %v400_v45 = vmul.f32 0.5, %v398_v44  ;;  %v401_v56 = vmul.f32 0.5, %v399_v39 }
 0x454   :  { %1613 = vtanh.f32 %v400_v45 }
 0x458   :  { %v1612_v40 = vpop.eup %1611 }
 0x459   :  { %411 = vrot.lane.b32.xlu0 %v1612_v40, %s1769_s17 }
 0x45a   :  { %v1614_v46 = vpop.eup %1613 }
 0x45b   :  { %v404_v47 = vmul.f32 0.5, %v1614_v46 }
 0x45d   :  { %v406_v48 = vadd.f32 0.5, %v404_v47 }
 0x45f   :  { %v409_v51 = vmul.f32 %v406_v48, %v347_v21 }
 0x4cb   :  { %v412_v49 = vpop.permute.xlu0 %411 }
 0x4cc   :  { %v414_v50 = vmul.f32 %v412_v49, %v406_v48 }
 0x4ce   :  { %416 = vrot.lane.b32.xlu1 %v414_v50, %s1769_s17 }
 0x540   :  { %v417_v52 = vpop.permute.xlu1 %416 }
 0x541   :  { %v419_v53 = vadd.f32 %v417_v52, %v409_v51 }
 0x543   :  { %1615 = vtanh.f32 %v419_v53 }
 0x544   :  { %1617 = vtanh.f32 %v401_v56 }
 0x549   :  { %v1616_v54 = vpop.eup %1615 }
 0x54a   :  { %422 = vrot.lane.b32.xlu2 %v1616_v54, %s1769_s17  ;;  %v1618_v57 = vpop.eup %1617 }
 0x54b   :  { %v405_v58 = vmul.f32 0.5, %v1618_v57 }
 0x54d   :  { %v407_v59 = vadd.f32 0.5, %v405_v58 }
 0x5a4   :  { %v423_v60 = vpop.permute.xlu2 %422 }
 0x5a5   :  { %v425_v61 = vmul.f32 %v423_v60, %v407_v59 }
 0x5a7   :  { %426 = vst.msk [vmem:[#allocation2 + $0x10] sm:$0xff] %vm210_vm1, %v425_v61  ;;  %1535 = vmatmul.msk.f32.vlgmr.msrb.gmra.mxu2 %vm210_vm1, %v425_v61  ;;  %1536 = vmatmul.msk.f32.vlgmr.msrb.gmra.mxu3 %vm210_vm1, %v425_v61 }
 0x5a8   :  { %726 = vmatpush.msrb.mxu2 %v1801_v7  ;;  %746 = vmatpush.msrb.mxu3 %v1791_v0  ;;  %v195_v0 = vpop.f32.mrf.mxu1 }
 0x5aa   :  { %727 = vmatpush.msrb.mxu2 %v1804_v8  ;;  %747 = vmatpush.msrb.mxu3 %v1793_v1  ;;  %v196_v1 = vadd.f32 %v195_v0, %v1910_v27  ;;  %v154_v8 = vpop.f32.mrf.mxu0 }
 0x5ac   :  { %728 = vmatpush.msrb.mxu2 %v1813_v13  ;;  %748 = vmatpush.msrb.mxu3 %v1796_v2 }
 0x5ae   :  { %729 = vmatpush.msrb.mxu2 %v1819_v16  ;;  %749 = vmatpush.msrb.mxu3 %v1799_v5 }
 0x5b0   :  { %730 = vmatpush.msrb.mxu2 %v1826_v19  ;;  %750 = vmatpush.msrb.mxu3 %v1806_v9  ;;  %v155_v9 = vadd.f32 %v154_v8, %v1914_v33 }
 0x5b2   :  { %731 = vmatpush.msrb.mxu2 %v1833_v22  ;;  %751 = vmatpush.msrb.mxu3 %v1815_v14 }
 0x5b4   :  { %732 = vmatpush.msrb.mxu2 %v1838_v23  ;;  %752 = vmatpush.msrb.mxu3 %v1821_v17 }
 0x5b6   :  { %733 = vmatpush.msrb.mxu2 %v1842_v25  ;;  %753 = vmatpush.msrb.mxu3 %v1828_v20  ;;  %v94_v25 = vld [vmem:[%s2273_s0 + $0x20] sm:$0xff]  ;;  %s1770_s0 = smov 96  }
 0x5b7   :  { %1519 = vmatmul.msk.f32.gmra.mxu0 %vm103_vm0, %v94_v25  ;;  %1527 = vmatmul.msk.f32.gmra.mxu1 %vm103_vm0, %v94_v25 }
 0x5bf   :  { %1520 = vmatmul.msk.f32.gmra.mxu0 %vm103_vm0, %v95_v62  ;;  %1528 = vmatmul.msk.f32.gmra.mxu1 %vm103_vm0, %v95_v62  ;;  %v60_v62 = vld [vmem:[#allocation3 + $0x100] sm:$0xff] }
 0x5c7   :  { %1521 = vmatmul.msk.f32.gmra.mxu0 %vm103_vm0, %v96_v63  ;;  %1529 = vmatmul.msk.f32.gmra.mxu1 %vm103_vm0, %v96_v63  ;;  %v61_v63 = vld [vmem:[#allocation3 + $0x108] sm:$0xff] }
 0x5cf   :  { %1522 = vmatmul.msk.f32.gmra.mxu0 %vm103_vm0, %v97_v6  ;;  %1530 = vmatmul.msk.f32.gmra.mxu1 %vm103_vm0, %v97_v6  ;;  %v56_v6 = vld [vmem:[#allocation3 + $0xe0] sm:$0xff] }
 0x62a   :  { %v467_v2 = vpop.f32.mrf.mxu3  ;;  %v447_v13 = vpop.f32.mrf.mxu2 }
 0x62b   :  { %v471_v5 = vadd.f32 %v467_v2, %v196_v1  ;;  %v470_v14 = vadd.f32 %v447_v13, %v155_v9 }
 0x62d   :  { %1619 = vtanh.f32 %v471_v5  ;;  %v472_v16 = vmul.f32 0.5, %v470_v14  ;;  %v473_v12 = vmul.f32 0.5, %v471_v5 }
 0x62f   :  { %1621 = vtanh.f32 %v472_v16 }
 0x633   :  { %v1620_v7 = vpop.eup %1619 }
 0x634   :  { %483 = vrot.lane.b32.xlu0 %v1620_v7, %s1769_s17  ;;  %v198_v29 = vpop.f32.mrf.mxu1  ;;  %v157_v38 = vpop.f32.mrf.mxu0 }
 0x635   :  { %v1622_v17 = vpop.eup %1621  ;;  %v199_v34 = vadd.f32 %v198_v29, %v1910_v27  ;;  %v158_v42 = vadd.f32 %v157_v38, %v1914_v33 }
 0x636   :  { %v476_v19 = vmul.f32 0.5, %v1622_v17 }
 0x638   :  { %v478_v22 = vadd.f32 0.5, %v476_v19 }
 0x63a   :  { %v481_v3 = vmul.f32 %v478_v22, %v419_v53 }
 0x63c   :  { %v201_v30 = vpop.f32.mrf.mxu1  ;;  %v160_v39 = vpop.f32.mrf.mxu0 }
 0x63d   :  { %v202_v61 = vadd.f32 %v201_v30, %v1910_v27  ;;  %v161_v7 = vadd.f32 %v160_v39, %v1914_v33  ;;  %v787_v30 = vld [vmem:[#allocation2] sm:$0xff] }
 0x644   :  { %v2029_v31 = vpop.f32.mrf.mxu1  ;;  %v2035_v40 = vpop.f32.mrf.mxu0 }
 0x645   :  { %v205_v39 = vadd.f32 %v2029_v31, %v1910_v27 }
 0x64c   :  { %v2031_v32 = vpop.f32.mrf.mxu1  ;;  %v2037_v41 = vpop.f32.mrf.mxu0 }
 0x6a6   :  { %v484_v20 = vpop.permute.xlu0 %483 }
 0x6a7   :  { %v486_v23 = vmul.f32 %v484_v20, %v478_v22 }
 0x6a9   :  { %488 = vrot.lane.b32.xlu1 %v486_v23, %s1769_s17 }
 0x71b   :  { %v489_v4 = vpop.permute.xlu1 %488 }
 0x71c   :  { %v491_v10 = vadd.f32 %v489_v4, %v481_v3  ;;  %v58_v3 = vld [vmem:[#allocation3 + $0xf0] sm:$0xff]  ;;  %v59_v4 = vld [vmem:[#allocation3 + $0xf8] sm:$0xff] }
 0x71e   :  { %1623 = vtanh.f32 %v491_v10 }
 0x71f   :  { %1625 = vtanh.f32 %v473_v12  ;;  %v55_v12 = vld [vmem:[#allocation3 + $0xd8] sm:$0xff] }
 0x724   :  { %v1624_v11 = vpop.eup %1623 }
 0x725   :  { %494 = vrot.lane.b32.xlu2 %v1624_v11, %s1769_s17  ;;  %v1626_v15 = vpop.eup %1625  ;;  %v54_v11 = vld [vmem:[#allocation3 + $0xd0] sm:$0xff] }
 0x726   :  { %v477_v18 = vmul.f32 0.5, %v1626_v15 }
 0x728   :  { %v479_v21 = vadd.f32 0.5, %v477_v18 }
 0x77f   :  { %v495_v26 = vpop.permute.xlu2 %494 }
 0x780   :  { %v497_v28 = vmul.f32 %v495_v26, %v479_v21 }
 0x782   :  { %498 = vst.msk [vmem:[#allocation2 + $0x18] sm:$0xff] %vm210_vm1, %v497_v28  ;;  %1537 = vmatmul.msk.f32.vlgmr.msrb.gmra.mxu0 %vm210_vm1, %v497_v28  ;;  %1538 = vmatmul.msk.f32.vlgmr.msrb.gmra.mxu1 %vm210_vm1, %v497_v28 }
 0x783   :  { %836 = vmatpush.msrb.mxu0 %v60_v62  ;;  %877 = vmatpush.msrb.mxu1 %v61_v63  ;;  %v208_v62 = vadd.f32 %v2031_v32, %v1910_v27 }
 0x785   :  { %837 = vmatpush.msrb.mxu0 %v58_v3  ;;  %878 = vmatpush.msrb.mxu1 %v59_v4 }
 0x787   :  { %838 = vmatpush.msrb.mxu0 %v56_v6 }
 0x789   :  { %839 = vmatpush.msrb.mxu0 %v54_v11  ;;  %v167_v11 = vadd.f32 %v2037_v41, %v1914_v33 }
 0x7ff   :  { %v539_v35 = vpop.f32.mrf.mxu1  ;;  %v519_v43 = vpop.f32.mrf.mxu0 }
 0x800   :  { %v543_v36 = vadd.f32 %v539_v35, %v199_v34  ;;  %v542_v44 = vadd.f32 %v519_v43, %v158_v42  ;;  %v2058_v34 = vld [vmem:[#allocation2 + $0x8] sm:$0xff]  ;;  %v789_v35 = vld [vmem:[#allocation2 + $0x10] sm:$0xff] }
 0x802   :  { %1627 = vtanh.f32 %v543_v36  ;;  %v544_v45 = vmul.f32 0.5, %v542_v44  ;;  %v545_v55 = vmul.f32 0.5, %v543_v36  ;;  %v2066_v36 = vld [vmem:[#allocation2 + $0x18] sm:$0xff] }
 0x804   :  { %1629 = vtanh.f32 %v544_v45 }
 0x808   :  { %v1628_v37 = vpop.eup %1627 }
 0x809   :  { %555 = vrot.lane.b32.xlu0 %v1628_v37, %s1769_s17 }
 0x80a   :  { %v1630_v46 = vpop.eup %1629 }
 0x80b   :  { %v548_v47 = vmul.f32 0.5, %v1630_v46 }
 0x80d   :  { %v550_v48 = vadd.f32 0.5, %v548_v47 }
 0x80f   :  { %v553_v51 = vmul.f32 %v550_v48, %v491_v10  ;;  %v57_v10 = vld [vmem:[#allocation3 + $0xe8] sm:$0xff] }
 0x810   :  { %879 = vmatpush.msrb.mxu1 %v57_v10 }
 0x812   :  { %880 = vmatpush.msrb.mxu1 %v55_v12 }
 0x87b   :  { %v556_v49 = vpop.permute.xlu0 %555 }
 0x87c   :  { %v558_v50 = vmul.f32 %v556_v49, %v550_v48 }
 0x87e   :  { %560 = vrot.lane.b32.xlu1 %v558_v50, %s1769_s17 }
 0x8f0   :  { %v561_v52 = vpop.permute.xlu1 %560 }
 0x8f1   :  { %v563_v53 = vadd.f32 %v561_v52, %v553_v51  ;;  %v164_v52 = vadd.f32 %v2035_v40, %v1914_v33  ;;  %v68_v40 = vld [vmem:[#allocation3 + $0x140] sm:$0xff] }
 0x8f3   :  { %1631 = vtanh.f32 %v563_v53 }
 0x8f4   :  { %1633 = vtanh.f32 %v545_v55 }
 0x8f9   :  { %v1632_v54 = vpop.eup %1631 }
 0x8fa   :  { %566 = vrot.lane.b32.xlu2 %v1632_v54, %s1769_s17  ;;  %v1634_v56 = vpop.eup %1633 }
 0x8fb   :  { %v549_v57 = vmul.f32 0.5, %v1634_v56 }
 0x8fd   :  { %v551_v58 = vadd.f32 0.5, %v549_v57 }
 0x954   :  { %v567_v59 = vpop.permute.xlu2 %566 }
 0x955   :  { %v569_v60 = vmul.f32 %v567_v59, %v551_v58 }
 0x957   :  { %570 = vst.msk [vmem:[#allocation2 + $0x20] sm:$0xff] %vm210_vm1, %v569_v60  ;;  %1539 = vmatmul.msk.f32.vlgmr.msra.gmra.mxu2 %vm210_vm1, %v569_v60  ;;  %1540 = vmatmul.msk.f32.vlgmr.msra.gmra.mxu3 %vm210_vm1, %v569_v60 }
 0x958   :  { %943 = vmatpush.msra.mxu2 %v68_v40 }
 0x95e   :  { %v2072_v37 = vld [vmem:[#allocation2 + $0x20] sm:$0xff] }
 0x9da   :  { %v611_v0 = vpop.f32.mrf.mxu3  ;;  %v591_v5 = vpop.f32.mrf.mxu2 }
 0x9db   :  { %v615_v1 = vadd.f32 %v611_v0, %v202_v61  ;;  %v614_v8 = vadd.f32 %v591_v5, %v161_v7  ;;  %v67_v5 = vld [vmem:[#allocation3 + $0x138] sm:$0xff]  ;;  %v64_v7 = vld [vmem:[#allocation3 + $0x120] sm:$0xff] }
 0x9dd   :  { %1635 = vtanh.f32 %v615_v1  ;;  %v616_v9 = vmul.f32 0.5, %v614_v8  ;;  %v617_v15 = vmul.f32 0.5, %v615_v1  ;;  %v69_v1 = vld [vmem:[#allocation3 + $0x148] sm:$0xff] }
 0x9de   :  { %984 = vmatpush.msra.mxu3 %v69_v1  ;;  %v65_v8 = vld [vmem:[#allocation3 + $0x128] sm:$0xff] }
 0x9df   :  { %1637 = vtanh.f32 %v616_v9  ;;  %v62_v9 = vld [vmem:[#allocation3 + $0x110] sm:$0xff] }
 0x9e0   :  { %985 = vmatpush.msra.mxu3 %v67_v5 }
 0x9e2   :  { %986 = vmatpush.msra.mxu3 %v65_v8 }
 0x9e3   :  { %v1636_v2 = vpop.eup %1635 }
 0x9e4   :  { %627 = vrot.lane.b32.xlu0 %v1636_v2, %s1769_s17  ;;  %v66_v2 = vld [vmem:[#allocation3 + $0x130] sm:$0xff] }
 0x9e5   :  { %v1638_v13 = vpop.eup %1637  ;;  %944 = vmatpush.msra.mxu2 %v66_v2 }
 0x9e6   :  { %v620_v14 = vmul.f32 0.5, %v1638_v13  ;;  %v63_v13 = vld [vmem:[#allocation3 + $0x118] sm:$0xff] }
 0x9e7   :  { %945 = vmatpush.msra.mxu2 %v64_v7  ;;  %987 = vmatpush.msra.mxu3 %v63_v13 }
 0x9e8   :  { %v622_v16 = vadd.f32 0.5, %v620_v14 }
 0x9e9   :  { %946 = vmatpush.msra.mxu2 %v62_v9 }
 0x9ea   :  { %v625_v22 = vmul.f32 %v622_v16, %v563_v53 }
 0xa56   :  { %v628_v17 = vpop.permute.xlu0 %627 }
 0xa57   :  { %v630_v19 = vmul.f32 %v628_v17, %v622_v16 }
 0xa59   :  { %632 = vrot.lane.b32.xlu1 %v630_v19, %s1769_s17 }
 0xacb   :  { %v633_v20 = vpop.permute.xlu1 %632 }
 0xacc   :  { %v2049_v23 = vadd.f32 %v633_v20, %v625_v22 }
 0xace   :  { %1639 = vtanh.f32 %v2049_v23 }
 0xacf   :  { %1641 = vtanh.f32 %v617_v15 }
 0xad4   :  { %v1640_v25 = vpop.eup %1639 }
 0xad5   :  { %638 = vrot.lane.b32.xlu2 %v1640_v25, %s1769_s17  ;;  %v1642_v18 = vpop.eup %1641 }
 0xad6   :  { %v621_v21 = vmul.f32 0.5, %v1642_v18 }
 0xad8   :  { %v623_v26 = vadd.f32 0.5, %v621_v21 }
 0xb2f   :  { %v639_v28 = vpop.permute.xlu2 %638 }
 0xb30   :  { %v641_v29 = vmul.f32 %v639_v28, %v623_v26 }
 0xb32   :  { %642 = vst.msk [vmem:[#allocation2 + $0x28] sm:$0xff] %vm210_vm1, %v641_v29  ;;  %1541 = vmatmul.msk.f32.vlgmr.msra.gmra.mxu0 %vm210_vm1, %v641_v29  ;;  %1542 = vmatmul.msk.f32.vlgmr.msra.gmra.mxu1 %vm210_vm1, %v641_v29 }
 0xb39   :  { %v792_v38 = vld [vmem:[#allocation2 + $0x28] sm:$0xff] }
 0xb3a   :  { %1545 = vmatmul.msk.f32.vlgmr.msrb.gmra.mxu0 %vm103_vm0, %v787_v30  ;;  %1553 = vmatmul.msk.f32.vlgmr.msrb.gmra.mxu1 %vm103_vm0, %v787_v30 }
 0xb42   :  { %1546 = vmatmul.msk.f32.gmra.mxu0 %vm103_vm0, %v2058_v34  ;;  %1554 = vmatmul.msk.f32.gmra.mxu1 %vm103_vm0, %v2058_v34 }
 0xb4a   :  { %1547 = vmatmul.msk.f32.gmra.mxu0 %vm103_vm0, %v789_v35  ;;  %1555 = vmatmul.msk.f32.gmra.mxu1 %vm103_vm0, %v789_v35 }
 0xb52   :  { %1548 = vmatmul.msk.f32.gmra.mxu0 %vm103_vm0, %v2066_v36  ;;  %1556 = vmatmul.msk.f32.gmra.mxu1 %vm103_vm0, %v2066_v36 }
 0xb5a   :  { %1549 = vmatmul.msk.f32.gmra.mxu0 %vm103_vm0, %v2072_v37  ;;  %1557 = vmatmul.msk.f32.gmra.mxu1 %vm103_vm0, %v2072_v37 }
 0xb62   :  { %1550 = vmatmul.msk.f32.gmra.mxu0 %vm103_vm0, %v792_v38  ;;  %1558 = vmatmul.msk.f32.gmra.mxu1 %vm103_vm0, %v792_v38 }
 0xbaf   :  { %v683_v42 = vpop.f32.mrf.mxu1  ;;  %v663_v51 = vpop.f32.mrf.mxu0 }
 0xbb0   :  { %v687_v43 = vadd.f32 %v683_v42, %v205_v39  ;;  %v686_v53 = vadd.f32 %v663_v51, %v164_v52 }
 0xbb2   :  { %1643 = vtanh.f32 %v687_v43  ;;  %v688_v54 = vmul.f32 0.5, %v686_v53  ;;  %v689_v14 = vmul.f32 0.5, %v687_v43 }
 0xbb4   :  { %1645 = vtanh.f32 %v688_v54 }
 0xbb7   :  { %v882_v44 = vpop.f32.mrf.mxu1 }
 0xbb8   :  { %v1644_v45 = vpop.eup %1643  ;;  %v2116_v44 = vld [vmem:[#allocation3 + $0x190] sm:$0xff] }
 0xbb9   :  { %699 = vrot.lane.b32.xlu0 %v1644_v45, %s1769_s17  ;;  %v2118_v45 = vld [vmem:[#allocation3 + $0x180] sm:$0xff]  ;;  %1021 = vmatpush.msra.mxu0 %v2116_v44 }
 0xbba   :  { %v1646_v31 = vpop.eup %1645  ;;  %1070 = vmatpush.msra.mxu1 %v2116_v44 }
 0xbbb   :  { %v692_v55 = vmul.f32 0.5, %v1646_v31  ;;  %1022 = vmatpush.msra.mxu0 %v2118_v45 }
 0xbbc   :  { %1071 = vmatpush.msra.mxu1 %v2118_v45 }
 0xbbd   :  { %v694_v56 = vadd.f32 0.5, %v692_v55 }
 0xbbf   :  { %v884_v46 = vpop.f32.mrf.mxu1  ;;  %v697_v59 = vmul.f32 %v694_v56, %v2049_v23 }
 0xbc0   :  { %v2129_v46 = vld [vmem:[#allocation3 + $0x160] sm:$0xff] }
 0xbc7   :  { %v886_v47 = vpop.f32.mrf.mxu1 }
 0xbcf   :  { %v888_v48 = vpop.f32.mrf.mxu1 }
 0xbd7   :  { %v890_v49 = vpop.f32.mrf.mxu1 }
 0xbdf   :  { %v892_v50 = vpop.f32.mrf.mxu1 }
 0xc2b   :  { %v700_v57 = vpop.permute.xlu0 %699 }
 0xc2c   :  { %v702_v58 = vmul.f32 %v700_v57, %v694_v56 }
 0xc2e   :  { %704 = vrot.lane.b32.xlu1 %v702_v58, %s1769_s17 }
 0xca0   :  { %v705_v60 = vpop.permute.xlu1 %704 }
 0xca1   :  { %v707_v61 = vadd.f32 %v705_v60, %v697_v59 }
 0xca3   :  { %1647 = vtanh.f32 %v707_v61 }
 0xca4   :  { %1649 = vtanh.f32 %v689_v14 }
 0xca9   :  { %v1648_v0 = vpop.eup %1647 }
 0xcaa   :  { %710 = vrot.lane.b32.xlu2 %v1648_v0, %s1769_s17  ;;  %v1650_v16 = vpop.eup %1649 }
 0xcab   :  { %v693_v17 = vmul.f32 0.5, %v1650_v16 }
 0xcad   :  { %v695_v19 = vadd.f32 0.5, %v693_v17 }
 0xcb2   :  { %899 = vrot.lane.b32.xlu2 %v787_v30, %s1770_s0 }
 0xcba   :  { %903 = vrot.lane.b32.xlu2 %v789_v35, %s1770_s0 }
 0xcc2   :  { %909 = vrot.lane.b32.xlu2 %v792_v38, %s1770_s0 }
 0xd04   :  { %v711_v22 = vpop.permute.xlu2 %710 }
 0xd05   :  { %v713_v20 = vmul.f32 %v711_v22, %v695_v19 }
 0xd07   :  { %714 = vst.msk [vmem:[#allocation2 + $0x30] sm:$0xff] %vm210_vm1, %v713_v20  ;;  %1543 = vmatmul.msk.f32.vlgmr.msrb.gmra.mxu2 %vm210_vm1, %v713_v20  ;;  %1544 = vmatmul.msk.f32.vlgmr.msrb.gmra.mxu3 %vm210_vm1, %v713_v20 }
 0xd08   :  { %1217 = vmatpush.msrb.mxu2 %v2116_v44  ;;  %1266 = vmatpush.msrb.mxu3 %v2116_v44 }
 0xd0a   :  { %1218 = vmatpush.msrb.mxu2 %v2118_v45  ;;  %1267 = vmatpush.msrb.mxu3 %v2118_v45 }
 0xd0c   :  { %v900_v25 = vpop.permute.xlu2 %899 }
 0xd0e   :  { %v793_v23 = vld [vmem:[#allocation2 + $0x30] sm:$0xff] }
 0xd0f   :  { %1551 = vmatmul.msk.f32.gmra.mxu0 %vm103_vm0, %v793_v23  ;;  %1559 = vmatmul.msk.f32.gmra.mxu1 %vm103_vm0, %v793_v23 }
 0xd10   :  { %1561 = vmatmul.msk.f32.vlgmr.msra.gmra.mxu2 %vm103_vm0, %v900_v25  ;;  %1569 = vmatmul.msk.f32.vlgmr.msra.gmra.mxu3 %vm103_vm0, %v900_v25 }
 0xd14   :  { %v904_v35 = vpop.permute.xlu2 %903 }
 0xd1c   :  { %v910_v52 = vpop.permute.xlu2 %909 }
 0xd8a   :  { %v755_v63 = vpop.f32.mrf.mxu3  ;;  %v735_v10 = vpop.f32.mrf.mxu2 }
 0xd8b   :  { %v759_v3 = vadd.f32 %v755_v63, %v208_v62  ;;  %v758_v12 = vadd.f32 %v735_v10, %v167_v11 }
 0xd8c   :  { %v894_v4 = vpop.f32.mrf.mxu1 }
 0xd8d   :  { %1651 = vtanh.f32 %v759_v3  ;;  %v760_v15 = vmul.f32 0.5, %v758_v12 }
 0xd8f   :  { %1653 = vtanh.f32 %v760_v15 }
 0xd93   :  { %v1652_v6 = vpop.eup %1651  ;;  %v2139_v48 = vpop.f32.mrf.mxu3 }
 0xd94   :  { %771 = vrot.lane.b32.xlu0 %v1652_v6, %s1769_s17  ;;  %v2169_v55 = vpop.f32.mrf.mxu2 }
 0xd95   :  { %v1654_v18 = vpop.eup %1653 }
 0xd96   :  { %v764_v21 = vmul.f32 0.5, %v1654_v18 }
 0xd98   :  { %v766_v26 = vadd.f32 0.5, %v764_v21 }
 0xd9a   :  { %v769_v27 = vmul.f32 %v766_v26, %v707_v61  ;;  %v2177_v61 = vld [vmem:[#allocation3 + $0x150] ss:$8 sm:$0x3] }
 0xd9b   :  { %v2180_v40 = vperm.slane %v2177_v61, 0 }
 0xe06   :  { %v772_v28 = vpop.permute.xlu0 %771 }
 0xe07   :  { %v774_v29 = vmul.f32 %v772_v28, %v766_v26 }
 0xe09   :  { %776 = vrot.lane.b32.xlu1 %v774_v29, %s1769_s17 }
 0xe11   :  { %901 = vrot.lane.b32.xlu1 %v2058_v34, %s1770_s0  ;;  %v761_v34 = vmul.f32 0.5, %v759_v3 }
 0xe19   :  { %907 = vrot.lane.b32.xlu1 %v2072_v37, %s1770_s0 }
 0xe7b   :  { %v777_v32 = vpop.permute.xlu1 %776 }
 0xe7c   :  { %v779_v30 = vadd.f32 %v777_v32, %v769_v27 }
 0xe7e   :  { %1655 = vtanh.f32 %v779_v30 }
 0xe7f   :  { %1657 = vtanh.f32 %v761_v34 }
 0xe83   :  { %v902_v33 = vpop.permute.xlu1 %901 }
 0xe84   :  { %v1656_v41 = vpop.eup %1655  ;;  %1562 = vmatmul.msk.f32.gmra.mxu2 %vm103_vm0, %v902_v33  ;;  %1570 = vmatmul.msk.f32.gmra.mxu3 %vm103_vm0, %v902_v33 }
 0xe85   :  { %782 = vrot.lane.b32.xlu0 %v1656_v41, %s1769_s17  ;;  %v1658_v37 = vpop.eup %1657 }
 0xe86   :  { %v765_v38 = vmul.f32 0.5, %v1658_v37 }
 0xe88   :  { %v767_v39 = vadd.f32 0.5, %v765_v38 }
 0xe8b   :  { %v908_v50 = vpop.permute.xlu1 %907 }
 0xe8c   :  { %1563 = vmatmul.msk.f32.gmra.mxu2 %vm103_vm0, %v904_v35  ;;  %1571 = vmatmul.msk.f32.gmra.mxu3 %vm103_vm0, %v904_v35 }
 0xe8d   :  { %905 = vrot.lane.b32.xlu0 %v2066_v36, %s1770_s0  ;;  %v2123_v36 = vld [vmem:[#allocation3 + $0x170] sm:$0xff] }
 0xe8e   :  { %1023 = vmatpush.msra.mxu0 %v2123_v36  ;;  %1072 = vmatpush.msra.mxu1 %v2123_v36 }
 0xe8f   :  { %1219 = vmatpush.msrb.mxu2 %v2123_v36  ;;  %1268 = vmatpush.msrb.mxu3 %v2123_v36 }
 0xe90   :  { %1024 = vmatpush.msra.mxu0 %v2129_v46  ;;  %1073 = vmatpush.msra.mxu1 %v2129_v46 }
 0xe91   :  { %1220 = vmatpush.msrb.mxu2 %v2129_v46  ;;  %1269 = vmatpush.msrb.mxu3 %v2129_v46 }
 0xe92   :  { %1119 = vmatpush.msrb.mxu0 %v2116_v44  ;;  %1168 = vmatpush.msrb.mxu1 %v2116_v44 }
 0xe94   :  { %1120 = vmatpush.msrb.mxu0 %v2118_v45  ;;  %1169 = vmatpush.msrb.mxu1 %v2118_v45 }
 0xe95   :  { %911 = vrot.lane.b32.xlu0 %v793_v23, %s1770_s0 }
 0xe96   :  { %1121 = vmatpush.msrb.mxu0 %v2123_v36  ;;  %1170 = vmatpush.msrb.mxu1 %v2123_v36 }
 0xe98   :  { %1122 = vmatpush.msrb.mxu0 %v2129_v46  ;;  %1171 = vmatpush.msrb.mxu1 %v2129_v46 }
 0xef7   :  { %v783_v42 = vpop.permute.xlu0 %782 }
 0xef8   :  { %v785_v43 = vmul.f32 %v783_v42, %v767_v39 }
 0xefa   :  { %786 = vst.msk [vmem:[#allocation2 + $0x38] sm:$0xff] %vm210_vm1, %v785_v43 }
 0xeff   :  { %v906_v47 = vpop.permute.xlu0 %905 }
 0xf00   :  { %1564 = vmatmul.msk.f32.gmra.mxu2 %vm103_vm0, %v906_v47  ;;  %1572 = vmatmul.msk.f32.gmra.mxu3 %vm103_vm0, %v906_v47 }
 0xf01   :  { %v794_v49 = vld [vmem:[#allocation2 + $0x38] sm:$0xff] }
 0xf02   :  { %913 = vrot.lane.b32.xlu1 %v794_v49, %s1770_s0  ;;  %1552 = vmatmul.msk.f32.gmra.mxu0 %vm103_vm0, %v794_v49 }
 0xf03   :  { %1560 = vmatmul.msk.f32.gmra.mxu1 %vm103_vm0, %v794_v49 }
 0xf07   :  { %v992_v51 = vpop.f32.mrf.mxu3  ;;  %v912_v54 = vpop.permute.xlu0 %911 }
 0xf08   :  { %1565 = vmatmul.msk.f32.gmra.mxu2 %vm103_vm0, %v908_v50  ;;  %1573 = vmatmul.msk.f32.gmra.mxu3 %vm103_vm0, %v908_v50  ;;  %v2171_v57 = vpop.f32.mrf.mxu2 }
 0xf0a   :  { %1025 = vmatmul.f32.vlgmr.msra.gmra.mxu0 %v1768_v24  ;;  %v841_v24 = vpop.f32.mrf.mxu0 }
 0xf0b   :  { %1315 = vmatpush.msra.mxu0 %v2116_v44  ;;  %v842_v3 = vadd.f32 %v841_v24, %v2180_v40 }
 0xf0d   :  { %1316 = vmatpush.msra.mxu0 %v2118_v45 }
 0xf0f   :  { %1317 = vmatpush.msra.mxu0 %v2123_v36  ;;  %v994_v53 = vpop.f32.mrf.mxu3 }
 0xf10   :  { %1566 = vmatmul.msk.f32.gmra.mxu2 %vm103_vm0, %v910_v52  ;;  %1574 = vmatmul.msk.f32.gmra.mxu3 %vm103_vm0, %v910_v52  ;;  %v2175_v60 = vpop.f32.mrf.mxu2 }
 0xf11   :  { %1318 = vmatpush.msra.mxu0 %v2129_v46 }
 0xf12   :  { %v2167_v31 = vpop.f32.mrf.mxu0 }
 0xf13   :  { %v845_v39 = vadd.f32 %v2167_v31, %v2180_v40 }
 0xf18   :  { %1567 = vmatmul.msk.f32.gmra.mxu2 %vm103_vm0, %v912_v54  ;;  %1575 = vmatmul.msk.f32.gmra.mxu3 %vm103_vm0, %v912_v54 }
 0xf1a   :  { %v847_v56 = vpop.f32.mrf.mxu0 }
 0xf1b   :  { %v848_v16 = vadd.f32 %v847_v56, %v2180_v40 }
 0xf22   :  { %v850_v59 = vpop.f32.mrf.mxu0 }
 0xf23   :  { %v851_v8 = vadd.f32 %v850_v59, %v2180_v40 }
 0xf2a   :  { %v853_v0 = vpop.f32.mrf.mxu0 }
 0xf2b   :  { %v854_v1 = vadd.f32 %v853_v0, %v2180_v40 }
 0xf32   :  { %v2191_v23 = vpop.f32.mrf.mxu0 }
 0xf3a   :  { %v2193_v25 = vpop.f32.mrf.mxu0 }
 0xf74   :  { %v914_v58 = vpop.permute.xlu1 %913 }
 0xf75   :  { %1568 = vmatmul.msk.f32.gmra.mxu2 %vm103_vm0, %v914_v58  ;;  %1576 = vmatmul.msk.f32.gmra.mxu3 %vm103_vm0, %v914_v58 }
 0xf7f   :  { %v2195_v62 = vpop.f32.mrf.mxu0 }
 0xf80   :  { %v2207_v38 = vpop.f32.mrf.mxu1 }
 0xf83   :  { %v957_v2 = vpop.f32.mrf.mxu2  ;;  %v996_v5 = vpop.f32.mrf.mxu3 }
 0xf84   :  { %v2183_v7 = vadd.f32 %v957_v2, %v854_v1 }
 0xf87   :  { %v1026_v4 = vpop.f32.mrf.mxu0 }
 0xf8b   :  { %v960_v9 = vpop.f32.mrf.mxu2  ;;  %v998_v13 = vpop.f32.mrf.mxu3 }
 0xf8c   :  { %v2186_v14 = vadd.f32 %v960_v9, %v851_v8 }
 0xf93   :  { %v963_v17 = vpop.f32.mrf.mxu2  ;;  %v1000_v19 = vpop.f32.mrf.mxu3 }
 0xf94   :  { %v2189_v22 = vadd.f32 %v963_v17, %v848_v16 }
 0xf9b   :  { %v1002_v20 = vpop.f32.mrf.mxu3  ;;  %v966_v63 = vpop.f32.mrf.mxu2 }
 0xf9c   :  { %v1052_v42 = vadd.f32 %v966_v63, %v845_v39 }
 0xff8   :  { %v969_v6 = vpop.f32.mrf.mxu2  ;;  %v1004_v10 = vpop.f32.mrf.mxu3 }
 0xff9   :  { %v1006_v11 = vadd.f32 %v969_v6, %v842_v3 }
 0xffb   :  { %v1029_v12 = vadd.f32 %v1026_v4, %v1006_v11 }
 0xffd   :  { %1659 = vtanh.f32 %v1029_v12  ;;  %v1030_v18 = vmul.f32 0.5, %v1029_v12 }
 0xfff   :  { %1661 = vtanh.f32 %v1030_v18 }
0x1003   :  { %v1660_v15 = vpop.eup %1659 }
0x1004   :  { %1037 = vrot.lane.b32.xlu2 %v1660_v15, %s1771_s4 }
0x1005   :  { %v1662_v21 = vpop.eup %1661 }
0x1006   :  { %v1032_v26 = vmul.f32 0.5, %v1662_v21 }
0x1008   :  { %v1033_v28 = vadd.f32 0.5, %v1032_v26 }
0x100a   :  { %v1035_v32 = vmul.f32 0.0, %v1033_v28 }
0x105e   :  { %v1038_v29 = vpop.permute.xlu2 %1037 }
0x105f   :  { %v1040_v27 = vmul.f32 %v1038_v29, %v1033_v28 }
0x1061   :  { %1042 = vrot.lane.b32.xlu0 %v1040_v27, %s1771_s4 }
0x10d3   :  { %v1043_v30 = vpop.permute.xlu0 %1042 }
0x10d4   :  { %v1045_v33 = vadd.f32 %v1043_v30, %v1035_v32 }
0x10d6   :  { %1663 = vtanh.f32 %v1045_v33 }
0x10dc   :  { %v1664_v41 = vpop.eup %1663 }
0x10dd   :  { %1048 = vrot.lane.b32.xlu1 %v1664_v41, %s1771_s4 }
0x114f   :  { %v1049_v35 = vpop.permute.xlu1 %1048 }
0x1150   :  { %v1051_v34 = vmul.f32 %v1049_v35, %v1033_v28 }
0x1152   :  { %1054 = vrot.lane.b32.xlu2 %v1051_v34, %s1769_s17 }
0x11ac   :  { %v1055_v37 = vpop.permute.xlu2 %1054 }
0x11ad   :  { %1577 = vmatmul.msk.f32.vlgmr.msra.gmra.mxu1 %vm103_vm0, %v1055_v37 }
0x11ae   :  { %1364 = vmatpush.msra.mxu1 %v2116_v44 }
0x11b0   :  { %1365 = vmatpush.msra.mxu1 %v2118_v45 }
0x11b2   :  { %1366 = vmatpush.msra.mxu1 %v2123_v36 }
0x11b4   :  { %1367 = vmatpush.msra.mxu1 %v2129_v46 }
0x122a   :  { %v1075_v43 = vpop.f32.mrf.mxu1 }
0x122b   :  { %v1078_v47 = vadd.f32 %v1075_v43, %v1052_v42 }
0x122d   :  { %1665 = vtanh.f32 %v1078_v47  ;;  %v1079_v50 = vmul.f32 0.5, %v1078_v47 }
0x122f   :  { %1667 = vtanh.f32 %v1079_v50 }
0x1233   :  { %v1666_v49 = vpop.eup %1665 }
0x1234   :  { %1086 = vrot.lane.b32.xlu0 %v1666_v49, %s1771_s4 }
0x1235   :  { %v1668_v44 = vpop.eup %1667 }
0x1236   :  { %v1081_v45 = vmul.f32 0.5, %v1668_v44 }
0x1238   :  { %v1082_v51 = vadd.f32 0.5, %v1081_v45 }
0x123a   :  { %v1084_v46 = vmul.f32 %v1082_v51, %v1045_v33 }
0x12a6   :  { %v1087_v36 = vpop.permute.xlu0 %1086 }
0x12a7   :  { %v1089_v52 = vmul.f32 %v1087_v36, %v1082_v51 }
0x12a9   :  { %1091 = vrot.lane.b32.xlu1 %v1089_v52, %s1771_s4 }
0x131b   :  { %v1092_v53 = vpop.permute.xlu1 %1091 }
0x131c   :  { %v1094_v54 = vadd.f32 %v1092_v53, %v1084_v46  ;;  %v857_v53 = vadd.f32 %v2191_v23, %v2180_v40 }
0x131e   :  { %1669 = vtanh.f32 %v1094_v54 }
0x1324   :  { %v1670_v24 = vpop.eup %1669 }
0x1325   :  { %1097 = vrot.lane.b32.xlu2 %v1670_v24, %s1771_s4 }
0x137f   :  { %v1098_v31 = vpop.permute.xlu2 %1097 }
0x1380   :  { %v1100_v56 = vmul.f32 %v1098_v31, %v1082_v51 }
0x1382   :  { %1103 = vrot.lane.b32.xlu0 %v1100_v56, %s1769_s17 }
0x13f4   :  { %v1104_v58 = vpop.permute.xlu0 %1103 }
0x13f5   :  { %1578 = vmatmul.msk.f32.vlgmr.msrb.gmra.mxu0 %vm103_vm0, %v1104_v58 }
0x1472   :  { %v1124_v59 = vpop.f32.mrf.mxu0 }
0x1473   :  { %v1127_v0 = vadd.f32 %v1124_v59, %v2189_v22 }
0x1475   :  { %1671 = vtanh.f32 %v1127_v0  ;;  %v1128_v2 = vmul.f32 0.5, %v1127_v0 }
0x1477   :  { %1673 = vtanh.f32 %v1128_v2 }
0x147b   :  { %v1672_v1 = vpop.eup %1671 }
0x147c   :  { %1135 = vrot.lane.b32.xlu1 %v1672_v1, %s1771_s4 }
0x147d   :  { %v1674_v5 = vpop.eup %1673 }
0x147e   :  { %v1130_v8 = vmul.f32 0.5, %v1674_v5 }
0x1480   :  { %v1131_v9 = vadd.f32 0.5, %v1130_v8 }
0x1482   :  { %v1133_v17 = vmul.f32 %v1131_v9, %v1094_v54  ;;  %v1248_v54 = vadd.f32 %v2175_v60, %v857_v53 }
0x14ee   :  { %v1136_v13 = vpop.permute.xlu1 %1135 }
0x14ef   :  { %v1138_v16 = vmul.f32 %v1136_v13, %v1131_v9 }
0x14f1   :  { %1140 = vrot.lane.b32.xlu2 %v1138_v16, %s1771_s4 }
0x154b   :  { %v1141_v19 = vpop.permute.xlu2 %1140 }
0x154c   :  { %v1143_v20 = vadd.f32 %v1141_v19, %v1133_v17  ;;  %v860_v19 = vadd.f32 %v2193_v25, %v2180_v40 }
0x154e   :  { %1675 = vtanh.f32 %v1143_v20 }
0x1554   :  { %v1676_v63 = vpop.eup %1675 }
0x1555   :  { %1146 = vrot.lane.b32.xlu0 %v1676_v63, %s1771_s4 }
0x15c7   :  { %v1147_v22 = vpop.permute.xlu0 %1146 }
0x15c8   :  { %v1149_v3 = vmul.f32 %v1147_v22, %v1131_v9 }
0x15ca   :  { %1152 = vrot.lane.b32.xlu1 %v1149_v3, %s1769_s17 }
0x163c   :  { %v1153_v4 = vpop.permute.xlu1 %1152 }
0x163d   :  { %1579 = vmatmul.msk.f32.vlgmr.msrb.gmra.mxu1 %vm103_vm0, %v1153_v4 }
0x16ba   :  { %v1173_v6 = vpop.f32.mrf.mxu1 }
0x16bb   :  { %v1176_v10 = vadd.f32 %v1173_v6, %v2186_v14 }
0x16bd   :  { %1677 = vtanh.f32 %v1176_v10  ;;  %v1177_v12 = vmul.f32 0.5, %v1176_v10 }
0x16bf   :  { %1679 = vtanh.f32 %v1177_v12 }
0x16c3   :  { %v1678_v11 = vpop.eup %1677 }
0x16c4   :  { %1184 = vrot.lane.b32.xlu2 %v1678_v11, %s1771_s4 }
0x16c5   :  { %v1680_v15 = vpop.eup %1679 }
0x16c6   :  { %v1179_v18 = vmul.f32 0.5, %v1680_v15 }
0x16c8   :  { %v1180_v21 = vadd.f32 0.5, %v1179_v18 }
0x16ca   :  { %v1182_v29 = vmul.f32 %v1180_v21, %v1143_v20  ;;  %v1297_v20 = vadd.f32 %v2171_v57, %v860_v19 }
0x171e   :  { %v1185_v26 = vpop.permute.xlu2 %1184 }
0x171f   :  { %v1187_v28 = vmul.f32 %v1185_v26, %v1180_v21  ;;  %v797_v26 = vperm.slane %v2177_v61, 1 }
0x1721   :  { %1189 = vrot.lane.b32.xlu0 %v1187_v28, %s1771_s4  ;;  %v897_v28 = vadd.f32 %v2207_v38, %v797_v26 }
0x1793   :  { %v1190_v27 = vpop.permute.xlu0 %1189 }
0x1794   :  { %v1192_v32 = vadd.f32 %v1190_v27, %v1182_v29  ;;  %v1395_v29 = vadd.f32 %v2139_v48, %v897_v28 }
0x1796   :  { %1681 = vtanh.f32 %v1192_v32 }
0x179c   :  { %v1682_v30 = vpop.eup %1681 }
0x179d   :  { %1195 = vrot.lane.b32.xlu1 %v1682_v30, %s1771_s4 }
0x180f   :  { %v1196_v14 = vpop.permute.xlu1 %1195 }
0x1810   :  { %v1198_v33 = vmul.f32 %v1196_v14, %v1180_v21 }
0x1812   :  { %1201 = vrot.lane.b32.xlu2 %v1198_v33, %s1769_s17  ;;  %v863_v33 = vadd.f32 %v2195_v62, %v2180_v40 }
0x1814   :  { %v1346_v61 = vadd.f32 %v2169_v55, %v863_v33 }
0x186c   :  { %v1202_v41 = vpop.permute.xlu2 %1201 }
0x186d   :  { %1580 = vmatmul.msk.f32.vlgmr.msrb.gmra.mxu2 %vm103_vm0, %v1202_v41 }
0x18f0   :  { %v1222_v35 = vpop.f32.mrf.mxu2 }
0x18f1   :  { %v1225_v34 = vadd.f32 %v1222_v35, %v2183_v7  ;;  %v1396_v35 = vmul.f32 0.5, %v1395_v29 }
0x18f3   :  { %1683 = vtanh.f32 %v1225_v34  ;;  %v1226_v39 = vmul.f32 0.5, %v1225_v34 }
0x18f5   :  { %1685 = vtanh.f32 %v1226_v39 }
0x18f9   :  { %v1684_v37 = vpop.eup %1683 }
0x18fa   :  { %1233 = vrot.lane.b32.xlu0 %v1684_v37, %s1771_s4 }
0x18fb   :  { %v1686_v42 = vpop.eup %1685 }
0x18fc   :  { %v1228_v43 = vmul.f32 0.5, %v1686_v42 }
0x18fe   :  { %v1229_v47 = vadd.f32 0.5, %v1228_v43 }
0x1900   :  { %v1231_v44 = vmul.f32 %v1229_v47, %v1192_v32 }
0x196c   :  { %v1234_v49 = vpop.permute.xlu0 %1233 }
0x196d   :  { %v1236_v50 = vmul.f32 %v1234_v49, %v1229_v47 }
0x196f   :  { %1238 = vrot.lane.b32.xlu1 %v1236_v50, %s1771_s4 }
0x19e1   :  { %v1239_v45 = vpop.permute.xlu1 %1238 }
0x19e2   :  { %v1241_v51 = vadd.f32 %v1239_v45, %v1231_v44  ;;  %v83_v45 = vld [vmem:[#allocation3 + $0x210] sm:$0xff] }
0x19e3   :  { %1429 = vmatpush.msra.mxu2 %v83_v45 }
0x19e4   :  { %1687 = vtanh.f32 %v1241_v51 }
0x19ea   :  { %v1688_v36 = vpop.eup %1687 }
0x19eb   :  { %1244 = vrot.lane.b32.xlu2 %v1688_v36, %s1771_s4  ;;  %v81_v36 = vld [vmem:[#allocation3 + $0x1f0] sm:$0xff] }
0x1a45   :  { %v1245_v7 = vpop.permute.xlu2 %1244 }
0x1a46   :  { %v1247_v52 = vmul.f32 %v1245_v7, %v1229_v47  ;;  %v80_v7 = vld [vmem:[#allocation3 + $0x1e0] sm:$0xff] }
0x1a48   :  { %1250 = vrot.lane.b32.xlu0 %v1247_v52, %s1769_s17 }
0x1aba   :  { %v1251_v46 = vpop.permute.xlu0 %1250 }
0x1abb   :  { %1581 = vmatmul.msk.f32.vlgmr.msrb.gmra.mxu3 %vm103_vm0, %v1251_v46 }
0x1b3e   :  { %v1271_v24 = vpop.f32.mrf.mxu3 }
0x1b3f   :  { %v1274_v31 = vadd.f32 %v1271_v24, %v1248_v54 }
0x1b41   :  { %1689 = vtanh.f32 %v1274_v31  ;;  %v1275_v58 = vmul.f32 0.5, %v1274_v31 }
0x1b43   :  { %1691 = vtanh.f32 %v1275_v58 }
0x1b47   :  { %v1690_v56 = vpop.eup %1689 }
0x1b48   :  { %1282 = vrot.lane.b32.xlu1 %v1690_v56, %s1771_s4 }
0x1b49   :  { %v1692_v59 = vpop.eup %1691 }
0x1b4a   :  { %v1277_v0 = vmul.f32 0.5, %v1692_v59 }
0x1b4c   :  { %v1278_v1 = vadd.f32 0.5, %v1277_v0  ;;  %v79_v0 = vld [vmem:[#allocation3 + $0x1d0] sm:$0xff] }
0x1b4d   :  { %1454 = vmatpush.msra.mxu3 %v79_v0 }
0x1b4e   :  { %v1280_v8 = vmul.f32 %v1278_v1, %v1241_v51  ;;  %v82_v51 = vld [vmem:[#allocation3 + $0x200] sm:$0xff] }
0x1b4f   :  { %1430 = vmatpush.msra.mxu2 %v82_v51 }
0x1b51   :  { %1431 = vmatpush.msra.mxu2 %v81_v36 }
0x1b53   :  { %1432 = vmatpush.msra.mxu2 %v80_v7 }
0x1bba   :  { %v1283_v2 = vpop.permute.xlu1 %1282 }
0x1bbb   :  { %v1285_v5 = vmul.f32 %v1283_v2, %v1278_v1  ;;  %v77_v2 = vld [vmem:[#allocation3 + $0x1b0] sm:$0xff] }
0x1bbd   :  { %1287 = vrot.lane.b32.xlu2 %v1285_v5, %s1771_s4  ;;  %v76_v5 = vld [vmem:[#allocation3 + $0x1a0] sm:$0xff] }
0x1c17   :  { %v1288_v9 = vpop.permute.xlu2 %1287 }
0x1c18   :  { %v1290_v23 = vadd.f32 %v1288_v9, %v1280_v8  ;;  %v88_v8 = vld [vmem:[#allocation3 + $0x260] sm:$0xff] }
0x1c19   :  { %1479 = vmatpush.msrb.mxu0 %v88_v8 }
0x1c1a   :  { %1693 = vtanh.f32 %v1290_v23 }
0x1c20   :  { %v1694_v60 = vpop.eup %1693 }
0x1c21   :  { %1293 = vrot.lane.b32.xlu0 %v1694_v60, %s1771_s4  ;;  %v86_v60 = vld [vmem:[#allocation3 + $0x240] sm:$0xff] }
0x1c93   :  { %v1294_v13 = vpop.permute.xlu0 %1293 }
0x1c94   :  { %v1296_v16 = vmul.f32 %v1294_v13, %v1278_v1  ;;  %v78_v1 = vld [vmem:[#allocation3 + $0x1c0] sm:$0xff]  ;;  %v85_v13 = vld [vmem:[#allocation3 + $0x230] sm:$0xff] }
0x1c95   :  { %1455 = vmatpush.msra.mxu3 %v78_v1 }
0x1c96   :  { %1299 = vrot.lane.b32.xlu1 %v1296_v16, %s1769_s17 }
0x1c97   :  { %1456 = vmatpush.msra.mxu3 %v77_v2 }
0x1c99   :  { %1457 = vmatpush.msra.mxu3 %v76_v5 }
0x1d08   :  { %v1300_v17 = vpop.permute.xlu1 %1299 }
0x1d09   :  { %1582 = vmatmul.msk.f32.vlgmr.msra.gmra.mxu0 %vm103_vm0, %v1300_v17  ;;  %v84_v17 = vld [vmem:[#allocation3 + $0x220] ss:$0 sm:$0xff] }
0x1d86   :  { %v1320_v63 = vpop.f32.mrf.mxu0 }
0x1d87   :  { %v1323_v22 = vadd.f32 %v1320_v63, %v1297_v20 }
0x1d89   :  { %1695 = vtanh.f32 %v1323_v22  ;;  %v1324_v4 = vmul.f32 0.5, %v1323_v22 }
0x1d8b   :  { %1697 = vtanh.f32 %v1324_v4 }
0x1d8f   :  { %v1696_v3 = vpop.eup %1695 }
0x1d90   :  { %1331 = vrot.lane.b32.xlu2 %v1696_v3, %s1771_s4  ;;  %v89_v3 = vld [vmem:[#allocation3 + $0x270] ss:$0 sm:$0xff] }
0x1d91   :  { %v1698_v6 = vpop.eup %1697 }
0x1d92   :  { %v1326_v10 = vmul.f32 0.5, %v1698_v6 }
0x1d94   :  { %v1327_v11 = vadd.f32 0.5, %v1326_v10 }
0x1d96   :  { %v1329_v18 = vmul.f32 %v1327_v11, %v1290_v23  ;;  %v87_v23 = vld [vmem:[#allocation3 + $0x250] sm:$0xff] }
0x1d97   :  { %1480 = vmatpush.msrb.mxu0 %v87_v23 }
0x1d99   :  { %1481 = vmatpush.msrb.mxu0 %v86_v60 }
0x1d9b   :  { %1482 = vmatpush.msrb.mxu0 %v85_v13 }
0x1dea   :  { %v1332_v12 = vpop.permute.xlu2 %1331 }
0x1deb   :  { %v1334_v15 = vmul.f32 %v1332_v12, %v1327_v11 }
0x1ded   :  { %1336 = vrot.lane.b32.xlu0 %v1334_v15, %s1771_s4 }
0x1e5f   :  { %v1337_v21 = vpop.permute.xlu0 %1336 }
0x1e60   :  { %v1339_v25 = vadd.f32 %v1337_v21, %v1329_v18 }
0x1e62   :  { %1699 = vtanh.f32 %v1339_v25 }
0x1e63   :  { %1701 = vtanh.f32 %v1395_v29 }
0x1e68   :  { %v1700_v57 = vpop.eup %1699 }
0x1e69   :  { %1342 = vrot.lane.b32.xlu1 %v1700_v57, %s1771_s4  ;;  %v1702_v30 = vpop.eup %1701 }
0x1edb   :  { %v1343_v27 = vpop.permute.xlu1 %1342 }
0x1edc   :  { %v1345_v32 = vmul.f32 %v1343_v27, %v1327_v11 }
0x1ede   :  { %1348 = vrot.lane.b32.xlu2 %v1345_v32, %s1769_s17 }
0x1ee6   :  { %1402 = vrot.lane.b32.xlu2 %v1702_v30, %s1771_s4 }
0x1f38   :  { %v1349_v14 = vpop.permute.xlu2 %1348 }
0x1f39   :  { %1583 = vmatmul.msk.f32.vlgmr.msra.gmra.mxu1 %vm103_vm0, %v1349_v14 }
0x1f40   :  { %v1403_v47 = vpop.permute.xlu2 %1402 }
0x1fb6   :  { %v1369_v41 = vpop.f32.mrf.mxu1 }
0x1fb7   :  { %v1372_v38 = vadd.f32 %v1369_v41, %v1346_v61 }
0x1fb9   :  { %1703 = vtanh.f32 %v1372_v38  ;;  %v1373_v34 = vmul.f32 0.5, %v1372_v38 }
0x1fba   :  { %1705 = vtanh.f32 %v1396_v35 }
0x1fbb   :  { %1707 = vtanh.f32 %v1373_v34 }
0x1fbf   :  { %v1704_v48 = vpop.eup %1703 }
0x1fc0   :  { %1380 = vrot.lane.b32.xlu0 %v1704_v48, %s1771_s4  ;;  %v1706_v37 = vpop.eup %1705 }
0x1fc1   :  { %v1708_v39 = vpop.eup %1707  ;;  %v1398_v42 = vmul.f32 0.5, %v1706_v37 }
0x1fc2   :  { %v1375_v43 = vmul.f32 0.5, %v1708_v39 }
0x1fc3   :  { %v1399_v49 = vadd.f32 0.5, %v1398_v42 }
0x1fc4   :  { %v1376_v50 = vadd.f32 0.5, %v1375_v43 }
0x1fc5   :  { %v1405_v40 = vmul.f32 %v1403_v47, %v1399_v49 }
0x1fc6   :  { %v1378_v52 = vmul.f32 %v1376_v50, %v1339_v25 }
0x1fc7   :  { %1709 = vtanh.f32 %v1405_v40 }
0x1fcd   :  { %v1710_v44 = vpop.eup %1709 }
0x2032   :  { %v1381_v62 = vpop.permute.xlu0 %1380 }
0x2033   :  { %v1383_v55 = vmul.f32 %v1381_v62, %v1376_v50 }
0x2035   :  { %1385 = vrot.lane.b32.xlu1 %v1383_v55, %s1771_s4 }
0x203d   :  { %1408 = vrot.lane.b32.xlu1 %v1710_v44, %s1769_s17 }
0x20a7   :  { %v1386_v46 = vpop.permute.xlu1 %1385 }
0x20a8   :  { %v1388_v53 = vadd.f32 %v1386_v46, %v1378_v52 }
0x20aa   :  { %1711 = vtanh.f32 %v1388_v53 }
0x20af   :  { %v1409_v54 = vpop.permute.xlu1 %1408 }
0x20b0   :  { %v1712_v24 = vpop.eup %1711  ;;  %v1411_v31 = vmul.f32 %v1409_v54, %v1399_v49 }
0x20b1   :  { %1391 = vrot.lane.b32.xlu0 %v1712_v24, %s1771_s4 }
0x20b2   :  { %1488 = vrot.lane.b32.xlu1 %v1411_v31, %s1770_s0  ;;  %1413 = vrot.lane.b32.xlu2 %v1411_v31, %s1769_s17 }
0x210c   :  { %v1414_v56 = vpop.permute.xlu2 %1413 }
0x210d   :  { %1584 = vmatmul.msk.f32.vlgmr.msra.gmra.mxu2 %vm103_vm0, %v1414_v56 }
0x2123   :  { %v1392_v58 = vpop.permute.xlu0 %1391 }
0x2124   :  { %v1394_v59 = vmul.f32 %v1392_v58, %v1376_v50  ;;  %v1489_v10 = vpop.permute.xlu1 %1488 }
0x2126   :  { %1438 = vrot.lane.b32.xlu0 %v1394_v59, %s1769_s17 }
0x2190   :  { %v1434_v16 = vpop.f32.mrf.mxu2 }
0x2198   :  { %v1439_v9 = vpop.permute.xlu0 %1438 }
0x2199   :  { %1585 = vmatmul.msk.f32.vlgmr.msra.gmra.mxu3 %vm103_vm0, %v1439_v9  ;;  %v1495_v11 = vsel %vm103_vm0, %v1439_v9, %v1489_v10 }
0x221c   :  { %v1459_v19 = vpop.f32.mrf.mxu3 }
0x221d   :  { %v1460_v20 = vadd.f32 %v1459_v19, %v1434_v16 }
0x221f   :  { %v1462_v63 = vadd.f32 %v1460_v20, %v84_v17 }
0x2221   :  { %v1463_v22 = vmax.f32 %v1462_v63, 0.0 }
0x2223   :  { %1586 = vmatmul.msk.f32.vlgmr.msrb.gmra.mxu0 %vm103_vm0, %v1463_v22 }
0x22a0   :  { %v1484_v4 = vpop.f32.mrf.mxu0 }
0x22a1   :  { %v1485_v6 = vadd.f32 %v1484_v4, %v89_v3 }
0x22a3   :  { %1492 = vrot.lane.b32.xlu2 %v1485_v6, %s1769_s17 }
0x22fd   :  { %v1493_v12 = vpop.permute.xlu2 %1492 }
0x22fe   :  { %v1496_v15 = vsel %vm210_vm1, %v1495_v11, %v1493_v12 }
0x22ff   :  { %1497 = vst [vmem:[#allocation6] sm:$0xff] %v1496_v15 }
0x2300   :  { %1508 = dma.vmem_to_hbm [thread:$0]  %s1504_s6, 128, %s1506_s9, [#allocation5]  }
0x2301   :  { %1763 = dma.done.wait [#allocation5], 128  }
0x2302   :  { %1764 = vsyncadd [#allocation5], 4294967168 }
0x2303   :  { %1513 = vsyncpa [#allocation4], 1 }
0x2304   :  { %1514 = vsyncpa [#allocation5], 1 }

</bundles_post_ra>
